<compile_context>
chip_gen: v5e
topology: v5e:2x2
jax: 0.10.0
libtpu: 0.0.40
codegen_flags: <defaults>
</compile_context>

<pallas_src>
import jax
import jax.numpy as jnp
from jax.experimental import pallas as pl
from jax.experimental.pallas import tpu as pltpu


def _convnet_kernel(x_ref, w1_ref, b1_ref, w2_ref, b2_ref, w3_ref, b3_ref, o_ref):
    # x_ref : [L, B, Cin]     activations, length-major / channels-last
    # w1_ref: [3, Cin, C1]    conv1 taps   (w[k, ci, co] = torch_w[co, ci, k])
    # b1_ref: [1, C1]
    # w2_ref: [3*C1, C2]      conv2 im2col weight (row k*C1 + ci)
    # b2_ref: [1, C2]
    # w3_ref: [Lp*C2, Dout]   fc1 weight, row l*C2 + c (torch flatten folded in)
    # b3_ref: [1, Dout]
    # o_ref : [B, Dout]
    L, B, Cin = x_ref.shape
    C1 = w1_ref.shape[-1]
    C2 = w2_ref.shape[-1]
    Dout = w3_ref.shape[-1]
    Lp = L // 2

    # ---- conv1 ('same', k=3) + ReLU ---------------------------------------
    x = x_ref[...]
    zx = jnp.zeros((1, B, Cin), jnp.float32)
    x_pad = jnp.concatenate([zx, x, zx], axis=0)                 # [L+2, B, Cin]
    x_prev = x_pad[:-2].reshape(L * B, Cin)                      # x[l-1]
    x_cur = x.reshape(L * B, Cin)                                # x[l]
    x_next = x_pad[2:].reshape(L * B, Cin)                       # x[l+1]
    if Cin == 1:
        # Outer products on the VPU (K=1 matmuls would waste MXU pushes).
        h1 = (x_prev * w1_ref[0] + x_cur * w1_ref[1] + x_next * w1_ref[2]
              + b1_ref[...])
    else:
        im1 = jnp.concatenate([x_prev, x_cur, x_next], axis=-1)  # [L*B, 3*Cin]
        w1_flat = w1_ref[...].reshape(3 * Cin, C1)
        h1 = (jnp.dot(im1, w1_flat, preferred_element_type=jnp.float32)
              + b1_ref[...])
    h1 = jnp.maximum(h1, 0.0).reshape(L, B, C1)

    # ---- conv2 ('same', k=3): fused im2col -> one MXU matmul (K = 3*C1) ----
    zh = jnp.zeros((1, B, C1), jnp.float32)
    h1_pad = jnp.concatenate([zh, h1, zh], axis=0)               # [L+2, B, C1]
    im2 = jnp.concatenate([h1_pad[:-2], h1, h1_pad[2:]], axis=-1)  # [L, B, 3*C1]
    h2 = (jnp.dot(im2.reshape(L * B, 3 * C1), w2_ref[...],
                  preferred_element_type=jnp.float32) + b2_ref[...])
    h2 = h2.reshape(L, B, C2)

    # ---- MaxPool1d(kernel_size=2, stride=2) along the length axis ----------
    h2p = h2.reshape(Lp, 2, B, C2)
    pooled = jnp.maximum(h2p[:, 0], h2p[:, 1])                   # [Lp, B, C2]

    # TODO(synk): Dropout1d(0.25) is identity at inference; the training-mode
    # per-channel Bernoulli mask + 1/(1-p) rescale is not implemented.

    # ---- flatten -> ReLU -> fc1 -> ReLU -------------------------------------
    a = jnp.maximum(pooled, 0.0)
    # Lane-axis concat of the Lp pooled position slices builds [B, Lp*C2], so
    # fc1 is ONE matmul with K = Lp*C2 instead of Lp serial K=C2 matmuls.
    fc_in = jnp.concatenate([a[l] for l in range(Lp)], axis=-1)  # [B, Lp*C2]
    out = (jnp.dot(fc_in, w3_ref[...], preferred_element_type=jnp.float32)
           + b3_ref[...])
    o_ref[...] = jnp.maximum(out, 0.0).astype(o_ref.dtype)


def prepare_params(params):
    """One-time relayout of torch-format params into kernel layouts.

    Run ONCE outside the per-call forward (perf review item 1): these tiny
    transposes/reshapes must not be replayed on every forward call.
    """
    w1, b1, w2, b2, fw, fb = params
    C1, Cin, K1 = w1.shape
    C2, _, K2 = w2.shape
    Dout = fw.shape[0]
    Lp = fw.shape[1] // C2
    assert K1 == 3 and K2 == 3 and fw.shape[1] == C2 * Lp
    w1_k = jnp.transpose(w1, (2, 1, 0))                               # [3, Cin, C1]
    w2_k = jnp.transpose(w2, (2, 1, 0)).reshape(3 * C1, C2)           # [3*C1, C2]
    # torch.flatten index = c*Lp + l; kernel lane order is l*C2 + c.
    w3_k = jnp.transpose(fw.reshape(Dout, C2, Lp), (2, 1, 0)).reshape(Lp * C2, Dout)
    b1_k = b1.reshape(1, C1)
    b2_k = b2.reshape(1, C2)
    b3_k = fb.reshape(1, Dout)
    return (w1_k, b1_k, w2_k, b2_k, w3_k, b3_k)


@jax.jit
def convnet_forward(x, kparams):
    """x: [B, Cin, L] float32 (PyTorch NCL layout); kparams from prepare_params."""
    w1_k, b1_k, w2_k, b2_k, w3_k, b3_k = kparams
    B, Cin, L = x.shape
    Dout = w3_k.shape[-1]
    assert L % 2 == 0 and w3_k.shape[0] == w2_k.shape[-1] * (L // 2)
    assert Cin == w1_k.shape[1]

    # Pad batch to a multiple of 8 sublanes so in-kernel [L,B,C] <-> [L*B,C]
    # reshapes are layout-trivial.
    B_pad = ((B + 7) // 8) * 8
    if B_pad != B:
        x = jnp.concatenate([x, jnp.zeros((B_pad - B, Cin, L), x.dtype)], axis=0)
    # Only per-call layout op left: activation -> length-major [L, B, Cin].
    x_k = jnp.transpose(x, (2, 0, 1))

    out = pl.pallas_call(
        _convnet_kernel,
        out_shape=jax.ShapeDtypeStruct((B_pad, Dout), jnp.float32),
        in_specs=[pl.BlockSpec(memory_space=pltpu.MemorySpace.VMEM) for _ in range(7)],
        out_specs=pl.BlockSpec(memory_space=pltpu.MemorySpace.VMEM),
    )(x_k, w1_k, b1_k, w2_k, b2_k, w3_k, b3_k)
    return out[:B]


def init_convnet_params(key, input_dim=1, output_dim=16, seq_len=50):
    """PyTorch-default init: U(-1/sqrt(fan_in), 1/sqrt(fan_in)), torch layouts."""
    c1 = c2 = 8
    k = 3
    fan_fc = c2 * (seq_len // 2)       # 200, matches nn.Linear(200, output_dim)
    ks = jax.random.split(key, 6)

    def unif(kk, shape, fan_in):
        bound = 1.0 / (fan_in ** 0.5)
        return jax.random.uniform(kk, shape, minval=-bound, maxval=bound,
                                  dtype=jnp.float32)

    w1 = unif(ks[0], (c1, input_dim, k), input_dim * k)
    b1 = unif(ks[1], (c1,), input_dim * k)
    w2 = unif(ks[2], (c2, c1, k), c1 * k)
    b2 = unif(ks[3], (c2,), c1 * k)
    fw = unif(ks[4], (output_dim, fan_fc), fan_fc)
    fb = unif(ks[5], (output_dim,), fan_fc)
    return (w1, b1, w2, b2, fw, fb)


def reference_forward(x, params):
    """Pure-JAX (XLA) reference of the torch forward pass, f32-accurate matmuls."""
    w1, b1, w2, b2, fw, fb = params
    hp = jax.lax.Precision.HIGHEST

    def conv1d_same(a, w, b):
        ap = jnp.pad(a, ((0, 0), (0, 0), (1, 1)))
        y = (jnp.einsum('oc,bcl->bol', w[:, :, 0], ap[:, :, :-2], precision=hp)
             + jnp.einsum('oc,bcl->bol', w[:, :, 1], ap[:, :, 1:-1], precision=hp)
             + jnp.einsum('oc,bcl->bol', w[:, :, 2], ap[:, :, 2:], precision=hp))
        return y + b[None, :, None]

    y = jnp.maximum(conv1d_same(x, w1, b1), 0.0)
    y = conv1d_same(y, w2, b2)
    B_, C_, L_ = y.shape
    y = jnp.max(y.reshape(B_, C_, L_ // 2, 2), axis=-1)      # MaxPool1d(2)
    y = jnp.maximum(y.reshape(B_, -1), 0.0)                  # dropout=id, flatten, ReLU
    y = jnp.dot(y, fw.T, precision=hp) + fb                  # fc1
    return jnp.maximum(y, 0.0)                               # final ReLU


if __name__ == "__main__":
    # ConvNet(input_dim=1, output_dim=16); fc1 expects 200 = 8 ch * 25 pooled -> L = 50.
    batch, input_dim, seq_len, output_dim = 8, 1, 50, 16

    key = jax.random.PRNGKey(0)
    kx, kp = jax.random.split(key)
    x = jax.random.normal(kx, (batch, input_dim, seq_len), dtype=jnp.float32)
    params = init_convnet_params(kp, input_dim, output_dim, seq_len)
    kparams = prepare_params(params)          # one-time weight relayout

    out = convnet_forward(x, kparams)
    jax.block_until_ready(out)

    ref = reference_forward(x, params)
    assert out.shape == (batch, output_dim)
    assert jnp.allclose(out, ref, atol=1e-2, rtol=1e-2), float(jnp.max(jnp.abs(out - ref)))

    print("KERNEL_OK")
</pallas_src>

<mosaic_0001>
module attributes {stable_mosaic.version = 11 : i64} {
  func.func @_convnet_kernel(%arg0: memref<50x8x1xf32, #tpu.memory_space<vmem>>, %arg1: memref<3x1x8xf32, #tpu.memory_space<vmem>>, %arg2: memref<1x8xf32, #tpu.memory_space<vmem>>, %arg3: memref<24x8xf32, #tpu.memory_space<vmem>>, %arg4: memref<1x8xf32, #tpu.memory_space<vmem>>, %arg5: memref<200x16xf32, #tpu.memory_space<vmem>>, %arg6: memref<1x16xf32, #tpu.memory_space<vmem>>, %arg7: memref<8x16xf32, #tpu.memory_space<vmem>>) attributes {dimension_semantics = [], scalar_prefetch = 0 : i64, scratch_operands = 0 : i64, tpu.core_type = #tpu.core_type<tc>} {
    %c0 = arith.constant 0 : index
    %c0_0 = arith.constant 0 : index
    %c0_1 = arith.constant 0 : index
    %0 = vector.load %arg0[%c0, %c0_0, %c0_1] : memref<50x8x1xf32, #tpu.memory_space<vmem>>, vector<50x8x1xf32>
    %cst = arith.constant 0.000000e+00 : f32
    %1 = vector.broadcast %cst : f32 to vector<1x8x1xf32>
    %2 = tpu.concatenate %1, %0, %1 in 0 : vector<1x8x1xf32>, vector<50x8x1xf32>, vector<1x8x1xf32> -> vector<52x8x1xf32>
    %3 = vector.extract_strided_slice %2 {offsets = [0, 0, 0], sizes = [50, 8, 1], strides = [1, 1, 1]} : vector<52x8x1xf32> to vector<50x8x1xf32>
    %4 = vector.shape_cast %3 : vector<50x8x1xf32> to vector<400x1xf32>
    %5 = vector.shape_cast %0 : vector<50x8x1xf32> to vector<400x1xf32>
    %6 = vector.extract_strided_slice %2 {offsets = [2, 0, 0], sizes = [50, 8, 1], strides = [1, 1, 1]} : vector<52x8x1xf32> to vector<50x8x1xf32>
    %7 = vector.shape_cast %6 : vector<50x8x1xf32> to vector<400x1xf32>
    %c0_2 = arith.constant 0 : index
    %c0_3 = arith.constant 0 : index
    %c0_4 = arith.constant 0 : index
    %8 = vector.load %arg1[%c0_2, %c0_3, %c0_4] : memref<3x1x8xf32, #tpu.memory_space<vmem>>, vector<1x1x8xf32>
    %9 = vector.shape_cast %8 : vector<1x1x8xf32> to vector<1x8xf32>
    %10 = vector.broadcast %4 : vector<400x1xf32> to vector<400x8xf32>
    %11 = vector.broadcast %9 : vector<1x8xf32> to vector<400x8xf32>
    %12 = arith.mulf %10, %11 : vector<400x8xf32>
    %c1 = arith.constant 1 : index
    %c0_5 = arith.constant 0 : index
    %c0_6 = arith.constant 0 : index
    %13 = vector.load %arg1[%c1, %c0_5, %c0_6] : memref<3x1x8xf32, #tpu.memory_space<vmem>>, vector<1x1x8xf32>
    %14 = vector.shape_cast %13 : vector<1x1x8xf32> to vector<1x8xf32>
    %15 = vector.broadcast %5 : vector<400x1xf32> to vector<400x8xf32>
    %16 = vector.broadcast %14 : vector<1x8xf32> to vector<400x8xf32>
    %17 = arith.mulf %15, %16 : vector<400x8xf32>
    %18 = arith.addf %12, %17 : vector<400x8xf32>
    %c2 = arith.constant 2 : index
    %c0_7 = arith.constant 0 : index
    %c0_8 = arith.constant 0 : index
    %19 = vector.load %arg1[%c2, %c0_7, %c0_8] : memref<3x1x8xf32, #tpu.memory_space<vmem>>, vector<1x1x8xf32>
    %20 = vector.shape_cast %19 : vector<1x1x8xf32> to vector<1x8xf32>
    %21 = vector.broadcast %7 : vector<400x1xf32> to vector<400x8xf32>
    %22 = vector.broadcast %20 : vector<1x8xf32> to vector<400x8xf32>
    %23 = arith.mulf %21, %22 : vector<400x8xf32>
    %24 = arith.addf %18, %23 : vector<400x8xf32>
    %c0_9 = arith.constant 0 : index
    %c0_10 = arith.constant 0 : index
    %25 = vector.load %arg2[%c0_9, %c0_10] : memref<1x8xf32, #tpu.memory_space<vmem>>, vector<1x8xf32>
    %26 = vector.broadcast %25 : vector<1x8xf32> to vector<400x8xf32>
    %27 = arith.addf %24, %26 : vector<400x8xf32>
    %cst_11 = arith.constant 0.000000e+00 : f32
    %28 = vector.broadcast %cst_11 : f32 to vector<400x8xf32>
    %29 = arith.maximumf %27, %28 : vector<400x8xf32>
    %30 = vector.shape_cast %29 : vector<400x8xf32> to vector<50x8x8xf32>
    %cst_12 = arith.constant 0.000000e+00 : f32
    %31 = vector.broadcast %cst_12 : f32 to vector<1x8x8xf32>
    %32 = tpu.concatenate %31, %30, %31 in 0 : vector<1x8x8xf32>, vector<50x8x8xf32>, vector<1x8x8xf32> -> vector<52x8x8xf32>
    %33 = vector.extract_strided_slice %32 {offsets = [0, 0, 0], sizes = [50, 8, 8], strides = [1, 1, 1]} : vector<52x8x8xf32> to vector<50x8x8xf32>
    %34 = vector.extract_strided_slice %32 {offsets = [2, 0, 0], sizes = [50, 8, 8], strides = [1, 1, 1]} : vector<52x8x8xf32> to vector<50x8x8xf32>
    %35 = tpu.concatenate %33, %30, %34 in 2 : vector<50x8x8xf32>, vector<50x8x8xf32>, vector<50x8x8xf32> -> vector<50x8x24xf32>
    %36 = vector.shape_cast %35 : vector<50x8x24xf32> to vector<400x24xf32>
    %c0_13 = arith.constant 0 : index
    %c0_14 = arith.constant 0 : index
    %37 = vector.load %arg3[%c0_13, %c0_14] : memref<24x8xf32, #tpu.memory_space<vmem>>, vector<24x8xf32>
    %cst_15 = arith.constant dense<0.000000e+00> : vector<400x8xf32>
    %38 = tpu.matmul %36, %37, %cst_15 {dimension_numbers = #tpu.dot_dimension_numbers<[1], [0], [0], [1], [0, 0, 1, 1], [], []>} : vector<400x24xf32>, vector<24x8xf32>, vector<400x8xf32> -> vector<400x8xf32>
    %c0_16 = arith.constant 0 : index
    %c0_17 = arith.constant 0 : index
    %39 = vector.load %arg4[%c0_16, %c0_17] : memref<1x8xf32, #tpu.memory_space<vmem>>, vector<1x8xf32>
    %40 = vector.broadcast %39 : vector<1x8xf32> to vector<400x8xf32>
    %41 = arith.addf %38, %40 : vector<400x8xf32>
    %42 = vector.shape_cast %41 : vector<400x8xf32> to vector<50x8x8xf32>
    %43 = vector.shape_cast %42 : vector<50x8x8xf32> to vector<25x2x8x8xf32>
    %44 = vector.extract_strided_slice %43 {offsets = [0, 0, 0, 0], sizes = [25, 1, 8, 8], strides = [1, 1, 1, 1]} : vector<25x2x8x8xf32> to vector<25x1x8x8xf32>
    %45 = vector.shape_cast %44 : vector<25x1x8x8xf32> to vector<25x8x8xf32>
    %46 = vector.extract_strided_slice %43 {offsets = [0, 1, 0, 0], sizes = [25, 1, 8, 8], strides = [1, 1, 1, 1]} : vector<25x2x8x8xf32> to vector<25x1x8x8xf32>
    %47 = vector.shape_cast %46 : vector<25x1x8x8xf32> to vector<25x8x8xf32>
    %48 = arith.maximumf %45, %47 : vector<25x8x8xf32>
    %cst_18 = arith.constant 0.000000e+00 : f32
    %49 = vector.broadcast %cst_18 : f32 to vector<25x8x8xf32>
    %50 = arith.maximumf %48, %49 : vector<25x8x8xf32>
    %51 = vector.extract_strided_slice %50 {offsets = [0, 0, 0], sizes = [1, 8, 8], strides = [1, 1, 1]} : vector<25x8x8xf32> to vector<1x8x8xf32>
    %52 = vector.shape_cast %51 : vector<1x8x8xf32> to vector<8x8xf32>
    %53 = vector.extract_strided_slice %50 {offsets = [1, 0, 0], sizes = [1, 8, 8], strides = [1, 1, 1]} : vector<25x8x8xf32> to vector<1x8x8xf32>
    %54 = vector.shape_cast %53 : vector<1x8x8xf32> to vector<8x8xf32>
    %55 = vector.extract_strided_slice %50 {offsets = [2, 0, 0], sizes = [1, 8, 8], strides = [1, 1, 1]} : vector<25x8x8xf32> to vector<1x8x8xf32>
    %56 = vector.shape_cast %55 : vector<1x8x8xf32> to vector<8x8xf32>
    %57 = vector.extract_strided_slice %50 {offsets = [3, 0, 0], sizes = [1, 8, 8], strides = [1, 1, 1]} : vector<25x8x8xf32> to vector<1x8x8xf32>
    %58 = vector.shape_cast %57 : vector<1x8x8xf32> to vector<8x8xf32>
    %59 = vector.extract_strided_slice %50 {offsets = [4, 0, 0], sizes = [1, 8, 8], strides = [1, 1, 1]} : vector<25x8x8xf32> to vector<1x8x8xf32>
    %60 = vector.shape_cast %59 : vector<1x8x8xf32> to vector<8x8xf32>
    %61 = vector.extract_strided_slice %50 {offsets = [5, 0, 0], sizes = [1, 8, 8], strides = [1, 1, 1]} : vector<25x8x8xf32> to vector<1x8x8xf32>
    %62 = vector.shape_cast %61 : vector<1x8x8xf32> to vector<8x8xf32>
    %63 = vector.extract_strided_slice %50 {offsets = [6, 0, 0], sizes = [1, 8, 8], strides = [1, 1, 1]} : vector<25x8x8xf32> to vector<1x8x8xf32>
    %64 = vector.shape_cast %63 : vector<1x8x8xf32> to vector<8x8xf32>
    %65 = vector.extract_strided_slice %50 {offsets = [7, 0, 0], sizes = [1, 8, 8], strides = [1, 1, 1]} : vector<25x8x8xf32> to vector<1x8x8xf32>
    %66 = vector.shape_cast %65 : vector<1x8x8xf32> to vector<8x8xf32>
    %67 = vector.extract_strided_slice %50 {offsets = [8, 0, 0], sizes = [1, 8, 8], strides = [1, 1, 1]} : vector<25x8x8xf32> to vector<1x8x8xf32>
    %68 = vector.shape_cast %67 : vector<1x8x8xf32> to vector<8x8xf32>
    %69 = vector.extract_strided_slice %50 {offsets = [9, 0, 0], sizes = [1, 8, 8], strides = [1, 1, 1]} : vector<25x8x8xf32> to vector<1x8x8xf32>
    %70 = vector.shape_cast %69 : vector<1x8x8xf32> to vector<8x8xf32>
    %71 = vector.extract_strided_slice %50 {offsets = [10, 0, 0], sizes = [1, 8, 8], strides = [1, 1, 1]} : vector<25x8x8xf32> to vector<1x8x8xf32>
    %72 = vector.shape_cast %71 : vector<1x8x8xf32> to vector<8x8xf32>
    %73 = vector.extract_strided_slice %50 {offsets = [11, 0, 0], sizes = [1, 8, 8], strides = [1, 1, 1]} : vector<25x8x8xf32> to vector<1x8x8xf32>
    %74 = vector.shape_cast %73 : vector<1x8x8xf32> to vector<8x8xf32>
    %75 = vector.extract_strided_slice %50 {offsets = [12, 0, 0], sizes = [1, 8, 8], strides = [1, 1, 1]} : vector<25x8x8xf32> to vector<1x8x8xf32>
    %76 = vector.shape_cast %75 : vector<1x8x8xf32> to vector<8x8xf32>
    %77 = vector.extract_strided_slice %50 {offsets = [13, 0, 0], sizes = [1, 8, 8], strides = [1, 1, 1]} : vector<25x8x8xf32> to vector<1x8x8xf32>
    %78 = vector.shape_cast %77 : vector<1x8x8xf32> to vector<8x8xf32>
    %79 = vector.extract_strided_slice %50 {offsets = [14, 0, 0], sizes = [1, 8, 8], strides = [1, 1, 1]} : vector<25x8x8xf32> to vector<1x8x8xf32>
    %80 = vector.shape_cast %79 : vector<1x8x8xf32> to vector<8x8xf32>
    %81 = vector.extract_strided_slice %50 {offsets = [15, 0, 0], sizes = [1, 8, 8], strides = [1, 1, 1]} : vector<25x8x8xf32> to vector<1x8x8xf32>
    %82 = vector.shape_cast %81 : vector<1x8x8xf32> to vector<8x8xf32>
    %83 = vector.extract_strided_slice %50 {offsets = [16, 0, 0], sizes = [1, 8, 8], strides = [1, 1, 1]} : vector<25x8x8xf32> to vector<1x8x8xf32>
    %84 = vector.shape_cast %83 : vector<1x8x8xf32> to vector<8x8xf32>
    %85 = vector.extract_strided_slice %50 {offsets = [17, 0, 0], sizes = [1, 8, 8], strides = [1, 1, 1]} : vector<25x8x8xf32> to vector<1x8x8xf32>
    %86 = vector.shape_cast %85 : vector<1x8x8xf32> to vector<8x8xf32>
    %87 = vector.extract_strided_slice %50 {offsets = [18, 0, 0], sizes = [1, 8, 8], strides = [1, 1, 1]} : vector<25x8x8xf32> to vector<1x8x8xf32>
    %88 = vector.shape_cast %87 : vector<1x8x8xf32> to vector<8x8xf32>
    %89 = vector.extract_strided_slice %50 {offsets = [19, 0, 0], sizes = [1, 8, 8], strides = [1, 1, 1]} : vector<25x8x8xf32> to vector<1x8x8xf32>
    %90 = vector.shape_cast %89 : vector<1x8x8xf32> to vector<8x8xf32>
    %91 = vector.extract_strided_slice %50 {offsets = [20, 0, 0], sizes = [1, 8, 8], strides = [1, 1, 1]} : vector<25x8x8xf32> to vector<1x8x8xf32>
    %92 = vector.shape_cast %91 : vector<1x8x8xf32> to vector<8x8xf32>
    %93 = vector.extract_strided_slice %50 {offsets = [21, 0, 0], sizes = [1, 8, 8], strides = [1, 1, 1]} : vector<25x8x8xf32> to vector<1x8x8xf32>
    %94 = vector.shape_cast %93 : vector<1x8x8xf32> to vector<8x8xf32>
    %95 = vector.extract_strided_slice %50 {offsets = [22, 0, 0], sizes = [1, 8, 8], strides = [1, 1, 1]} : vector<25x8x8xf32> to vector<1x8x8xf32>
    %96 = vector.shape_cast %95 : vector<1x8x8xf32> to vector<8x8xf32>
    %97 = vector.extract_strided_slice %50 {offsets = [23, 0, 0], sizes = [1, 8, 8], strides = [1, 1, 1]} : vector<25x8x8xf32> to vector<1x8x8xf32>
    %98 = vector.shape_cast %97 : vector<1x8x8xf32> to vector<8x8xf32>
    %99 = vector.extract_strided_slice %50 {offsets = [24, 0, 0], sizes = [1, 8, 8], strides = [1, 1, 1]} : vector<25x8x8xf32> to vector<1x8x8xf32>
    %100 = vector.shape_cast %99 : vector<1x8x8xf32> to vector<8x8xf32>
    %101 = tpu.concatenate %52, %54, %56, %58, %60, %62, %64, %66, %68, %70, %72, %74, %76, %78, %80, %82 in 1 : vector<8x8xf32>, vector<8x8xf32>, vector<8x8xf32>, vector<8x8xf32>, vector<8x8xf32>, vector<8x8xf32>, vector<8x8xf32>, vector<8x8xf32>, vector<8x8xf32>, vector<8x8xf32>, vector<8x8xf32>, vector<8x8xf32>, vector<8x8xf32>, vector<8x8xf32>, vector<8x8xf32>, vector<8x8xf32> -> vector<8x128xf32>
    %102 = tpu.concatenate %84, %86, %88, %90, %92, %94, %96, %98, %100 in 1 : vector<8x8xf32>, vector<8x8xf32>, vector<8x8xf32>, vector<8x8xf32>, vector<8x8xf32>, vector<8x8xf32>, vector<8x8xf32>, vector<8x8xf32>, vector<8x8xf32> -> vector<8x72xf32>
    %103 = tpu.concatenate %101, %102 in 1 : vector<8x128xf32>, vector<8x72xf32> -> vector<8x200xf32>
    %c0_19 = arith.constant 0 : index
    %c0_20 = arith.constant 0 : index
    %104 = vector.load %arg5[%c0_19, %c0_20] : memref<200x16xf32, #tpu.memory_space<vmem>>, vector<200x16xf32>
    %cst_21 = arith.constant dense<0.000000e+00> : vector<8x16xf32>
    %105 = tpu.matmul %103, %104, %cst_21 {dimension_numbers = #tpu.dot_dimension_numbers<[1], [0], [0], [1], [0, 0, 1, 1], [], []>} : vector<8x200xf32>, vector<200x16xf32>, vector<8x16xf32> -> vector<8x16xf32>
    %c0_22 = arith.constant 0 : index
    %c0_23 = arith.constant 0 : index
    %106 = vector.load %arg6[%c0_22, %c0_23] : memref<1x16xf32, #tpu.memory_space<vmem>>, vector<1x16xf32>
    %107 = vector.broadcast %106 : vector<1x16xf32> to vector<8x16xf32>
    %108 = arith.addf %105, %107 : vector<8x16xf32>
    %cst_24 = arith.constant 0.000000e+00 : f32
    %109 = vector.broadcast %cst_24 : f32 to vector<8x16xf32>
    %110 = arith.maximumf %108, %109 : vector<8x16xf32>
    %c0_25 = arith.constant 0 : index
    %c0_26 = arith.constant 0 : index
    %111 = vector.load %arg7[%c0_25, %c0_26] : memref<8x16xf32, #tpu.memory_space<vmem>>, vector<8x16xf32>
    tpu.vector_store %arg7[%c0_25, %c0_26], %110 {strides = array<i32>} : memref<8x16xf32, #tpu.memory_space<vmem>>, vector<8x16xf32>,
    return
  }
}

</mosaic_0001>

<bundles_post_ra>
// kernel: convnet_forward.1
= control target key start
LH: loop header
LB: loop body
LE: loop exit
PB: predicated region body
PF: predicated region fallthrough
CT: control target
= control target key end

     0   :  { %v1863_v3 = vmov 0   ;;  %s3296_s0 = inlined_call_operand.vmem [shape: f32[50,8,1], index: 0, kind: input, shape index: {}]   ;;  %s3297_s1 = inlined_call_operand.vmem [shape: f32[3,1,8], index: 1, kind: input, shape index: {}]   ;;  %s3298_s2 = inlined_call_operand.vmem [shape: f32[1,8], index: 2, kind: input, shape index: {}]   ;;  %s3299_s3 = inlined_call_operand.vmem [shape: f32[24,8], index: 3, kind: input, shape index: {}]   ;;  %s3300_s4 = inlined_call_operand.vmem [shape: f32[1,8], index: 4, kind: input, shape index: {}]   ;;  %s3301_s5 = inlined_call_operand.vmem [shape: f32[200,16], index: 5, kind: input, shape index: {}]   ;;  %s3302_s6 = inlined_call_operand.vmem [shape: f32[1,16], index: 6, kind: input, shape index: {}]   ;;  %s3303_s7 = inlined_call_operand.hbm [shape: f32[8,16], index: 7, kind: output, shape index: {}]  }
   0x1   :  { %v31_v0 = vld [vmem:[%s3296_s0 + $0x20] sm:$0xff]  ;;  %v29_v1 = vld [vmem:[%s3296_s0 + $0x10] sm:$0xff]  ;;  %1826 = vset.pattern.permute.xlu2 %v1863_v3  ;;  %1825 = vset.pattern.permute.xlu1 %v1863_v3  ;;  %v32_v4 = vld [vmem:[%s3296_s0 + $0x28] sm:$0xff] }
   0x2   :  { %v27_v2 = vld [vmem:[%s3296_s0] sm:$0xff]  ;;  %1824 = vset.pattern.permute.xlu0 %v1863_v3  ;;  %105 = vperm.xlu2 %1826, %v31_v0  }
   0x3   :  { %95 = vperm.xlu1 %1825, %v29_v1   ;;  %85 = vperm.xlu0 %1824, %v27_v2  }
   0x4   :  { %12 = vsyncpa [#allocation3], 0  ;;  %v30_v5 = vld [vmem:[%s3296_s0 + $0x18] sm:$0xff]  ;;  %v28_v6 = vld [vmem:[%s3296_s0 + $0x8] sm:$0xff]  ;;  %s1864_s26 = smov 8   ;;  %s1865_s27 = smov 16  }
   0x5   :  { %v35_v7 = vld [vmem:[%s3296_s0 + $0x40] sm:$0xff]  ;;  %v34_v8 = vld [vmem:[%s3296_s0 + $0x38] sm:$0xff]  ;;  %v33_v9 = vld [vmem:[%s3296_s0 + $0x30] sm:$0xff]  ;;  %vm1050_vm0 = vcmask 64512   ;;  %vm1101_vm1 = vcmask 130048   ;;  %vm1159_vm2 = vcmask 195584  }
   0x6   :  { %v38_v10 = vld [vmem:[%s3296_s0 + $0x58] sm:$0xff]  ;;  %v37_v11 = vld [vmem:[%s3296_s0 + $0x50] sm:$0xff]  ;;  %v36_v12 = vld [vmem:[%s3296_s0 + $0x48] sm:$0xff]  ;;  %s1868_s10 = smov 64   ;;  %s1869_s11 = smov 72   ;;  %vm1590_vm3 = vcmask 261120  }
   0x7   :  { %v41_v13 = vld [vmem:[%s3296_s0 + $0x70] sm:$0xff]  ;;  %v40_v14 = vld [vmem:[%s3296_s0 + $0x68] sm:$0xff]  ;;  %v39_v15 = vld [vmem:[%s3296_s0 + $0x60] sm:$0xff]  ;;  %s1870_s12 = smov 32   ;;  %s1873_s13 = smov 56   ;;  %vm1592_vm4 = vcmask 326656  }
   0x8   :  { %v44_v16 = vld [vmem:[%s3296_s0 + $0x88] sm:$0xff]  ;;  %v43_v17 = vld [vmem:[%s3296_s0 + $0x80] sm:$0xff]  ;;  %v42_v18 = vld [vmem:[%s3296_s0 + $0x78] sm:$0xff]  ;;  %s1875_s14 = smov 96   ;;  %s1876_s15 = smov 120   ;;  %vm1594_vm5 = vcmask 392192  }
   0x9   :  { %v47_v19 = vld [vmem:[%s3296_s0 + $0xa0] sm:$0xff]  ;;  %v46_v20 = vld [vmem:[%s3296_s0 + $0x98] sm:$0xff]  ;;  %v45_v21 = vld [vmem:[%s3296_s0 + $0x90] sm:$0xff]  ;;  %s1877_s18 = smov 88   ;;  %s1878_s21 = smov 112   ;;  %vm1596_vm6 = vcmask 457728  }
   0xa   :  { %110 = vperm.xlu2 %1826, %v32_v4   ;;  %v50_v22 = vld [vmem:[%s3296_s0 + $0xb8] sm:$0xff]  ;;  %v49_v23 = vld [vmem:[%s3296_s0 + $0xb0] sm:$0xff]  ;;  %v48_v24 = vld [vmem:[%s3296_s0 + $0xa8] sm:$0xff]  ;;  %s1879_s8 = smov 104   ;;  %vm1598_vm7 = vcmask 523264   ;;  %vm1600_vm8 = vcmask 588800  }
   0xb   :  { %100 = vperm.xlu1 %1825, %v30_v5   ;;  %90 = vperm.xlu0 %1824, %v28_v6   ;;  %v53_v25 = vld [vmem:[%s3296_s0 + $0xd0] sm:$0xff]  ;;  %v52_v26 = vld [vmem:[%s3296_s0 + $0xc8] sm:$0xff]  ;;  %v51_v27 = vld [vmem:[%s3296_s0 + $0xc0] sm:$0xff]  ;;  %vm1602_vm9 = vcmask 654336   ;;  %vm1604_vm10 = vcmask 719872   ;;  %vm1606_vm11 = vcmask 785408  }
   0xc   :  { %v64_v28 = vld [vmem:[%s3296_s0 + $0x128] sm:$0xff]  ;;  %v63_v29 = vld [vmem:[%s3296_s0 + $0x120] sm:$0xff]  ;;  %v62_v30 = vld [vmem:[%s3296_s0 + $0x118] sm:$0xff]  ;;  %vm1608_vm12 = vcmask 850944   ;;  %vm1610_vm13 = vcmask 916480   ;;  %vm1612_vm14 = vcmask 982016  }
   0xd   :  { %v67_v31 = vld [vmem:[%s3296_s0 + $0x140] sm:$0xff]  ;;  %v66_v32 = vld [vmem:[%s3296_s0 + $0x138] sm:$0xff]  ;;  %v65_v33 = vld [vmem:[%s3296_s0 + $0x130] sm:$0xff] }
   0xe   :  { %v55_v34 = vld [vmem:[%s3296_s0 + $0xe0] sm:$0xff]  ;;  %v68_v35 = vld [vmem:[%s3296_s0 + $0x148] sm:$0xff]  ;;  %v54_v36 = vld [vmem:[%s3296_s0 + $0xd8] sm:$0xff] }
   0xf   :  { %v61_v38 = vld [vmem:[%s3296_s0 + $0x110] sm:$0xff]  ;;  %v56_v39 = vld [vmem:[%s3296_s0 + $0xe8] sm:$0xff]  ;;  %v70_v43 = vld [vmem:[%s3296_s0 + $0x158] sm:$0xff] }
  0x10   :  { %v69_v40 = vld [vmem:[%s3296_s0 + $0x150] sm:$0xff]  ;;  %v58_v45 = vld [vmem:[%s3296_s0 + $0xf8] sm:$0xff]  ;;  %v71_v46 = vld [vmem:[%s3296_s0 + $0x160] sm:$0xff] }
  0x11   :  { %v57_v42 = vld [vmem:[%s3296_s0 + $0xf0] sm:$0xff]  ;;  %v2063_v50 = vld [vmem:[%s3297_s1] ss:$0 sm:$0xff]  ;;  %v2068_v51 = vld [vmem:[%s3297_s1 + $0x1] ss:$0 sm:$0xff] }
  0x12   :  { %125 = vperm.xlu2 %1826, %v35_v7   ;;  %v331_v52 = vmul.f32 0.0, %v2063_v50  ;;  %v2077_v55 = vld [vmem:[%s3297_s1 + $0x2] ss:$0 sm:$0xff]  ;;  %v2087_v62 = vld [vmem:[%s3298_s2] ss:$0 sm:$0xff] }
  0x13   :  { %120 = vperm.xlu1 %1825, %v34_v8   ;;  %115 = vperm.xlu0 %1824, %v33_v9  }
  0x1a   :  { %140 = vperm.xlu2 %1826, %v38_v10  }
  0x1b   :  { %135 = vperm.xlu1 %1825, %v37_v11   ;;  %130 = vperm.xlu0 %1824, %v36_v12  }
  0x22   :  { %155 = vperm.xlu2 %1826, %v41_v13  }
  0x23   :  { %150 = vperm.xlu1 %1825, %v40_v14   ;;  %145 = vperm.xlu0 %1824, %v39_v15  }
  0x2a   :  { %170 = vperm.xlu2 %1826, %v44_v16  }
  0x2b   :  { %165 = vperm.xlu1 %1825, %v43_v17   ;;  %160 = vperm.xlu0 %1824, %v42_v18  }
  0x32   :  { %185 = vperm.xlu2 %1826, %v47_v19  }
  0x33   :  { %180 = vperm.xlu1 %1825, %v46_v20   ;;  %175 = vperm.xlu0 %1824, %v45_v21  }
  0x3a   :  { %200 = vperm.xlu2 %1826, %v50_v22  }
  0x3b   :  { %195 = vperm.xlu1 %1825, %v49_v23   ;;  %190 = vperm.xlu0 %1824, %v48_v24  }
  0x42   :  { %215 = vperm.xlu2 %1826, %v53_v25  }
  0x43   :  { %210 = vperm.xlu1 %1825, %v52_v26   ;;  %205 = vperm.xlu0 %1824, %v51_v27  }
  0x4a   :  { %270 = vperm.xlu2 %1826, %v64_v28  }
  0x4b   :  { %265 = vperm.xlu1 %1825, %v63_v29   ;;  %260 = vperm.xlu0 %1824, %v62_v30  }
  0x52   :  { %285 = vperm.xlu2 %1826, %v67_v31  }
  0x53   :  { %280 = vperm.xlu1 %1825, %v66_v32   ;;  %275 = vperm.xlu0 %1824, %v65_v33  }
  0x5a   :  { %225 = vperm.xlu2 %1826, %v55_v34  }
  0x5b   :  { %290 = vperm.xlu1 %1825, %v68_v35   ;;  %220 = vperm.xlu0 %1824, %v54_v36  }
  0x5c   :  { %v2029_v37 = vpop.permute.xlu2 %105 }
  0x62   :  { %255 = vperm.xlu2 %1826, %v61_v38  }
  0x63   :  { %230 = vperm.xlu1 %1825, %v56_v39   ;;  %295 = vperm.xlu0 %1824, %v69_v40  }
  0x64   :  { %v2040_v41 = vpop.permute.xlu2 %110 }
  0x6a   :  { %235 = vperm.xlu2 %1826, %v57_v42  }
  0x6b   :  { %300 = vperm.xlu0 %1824, %v70_v43  }
  0x6c   :  { %v2048_v44 = vpop.permute.xlu2 %125 }
  0x72   :  { %240 = vperm.xlu2 %1826, %v58_v45  }
  0x73   :  { %305 = vperm.xlu0 %1824, %v71_v46  }
  0x74   :  { %v2056_v47 = vpop.permute.xlu2 %140 }
  0x75   :  { %v2058_v48 = vpop.permute.xlu1 %95  ;;  %v86_v49 = vpop.permute.xlu0 %85 }
  0x76   :  { %v391_v53 = vmul.f32 %v2068_v51, %v86_v49  ;;  %v332_v58 = vmul.f32 %v2063_v50, %v86_v49  ;;  %v497_v63 = vmul.f32 %v2077_v55, %v2058_v48  ;;  %v393_v3 = vmul.f32 %v2068_v51, %v2058_v48 }
  0x78   :  { %v441_v59 = vadd.f32 %v391_v53, %v331_v52 }
  0x7c   :  { %v2072_v54 = vpop.permute.xlu2 %155 }
  0x7d   :  { %v2079_v56 = vpop.permute.xlu1 %100  ;;  %v91_v57 = vpop.permute.xlu0 %90 }
  0x7e   :  { %v392_v60 = vmul.f32 %v2068_v51, %v91_v57  ;;  %v496_v61 = vmul.f32 %v2077_v55, %v91_v57  ;;  %v333_v0 = vmul.f32 %v2063_v50, %v91_v57  ;;  %v498_v11 = vmul.f32 %v2077_v55, %v2079_v56 }
  0x80   :  { %v442_v1 = vadd.f32 %v392_v60, %v332_v58  ;;  %v546_v2 = vadd.f32 %v496_v61, %v441_v59  ;;  %v443_v7 = vadd.f32 %v393_v3, %v333_v0 }
  0x82   :  { %v2095_v4 = vadd.f32 %v2087_v62, %v546_v2  ;;  %v547_v5 = vadd.f32 %v497_v63, %v442_v1  ;;  %v548_v14 = vadd.f32 %v498_v11, %v443_v7 }
  0x84   :  { %v2097_v6 = vpop.permute.xlu2 %170  ;;  %v3304_v10 = vmax.f32 %v2095_v4, 0.0  ;;  %v601_v12 = vadd.f32 %v2087_v62, %v547_v5  ;;  %v602_v18 = vadd.f32 %v2087_v62, %v548_v14 }
  0x85   :  { %v2099_v8 = vpop.permute.xlu1 %120  ;;  %v2101_v9 = vpop.permute.xlu0 %115 }
  0x86   :  { %750 = vrot.lane.b32.xlu1 %v3304_v10, %s1864_s26  ;;  %v2110_v13 = vmax.f32 %v601_v12, 0.0  ;;  %v2121_v19 = vmax.f32 %v602_v18, 0.0 }
  0x88   :  { %900 = vrot.lane.b32.xlu0 %v2110_v13, %s1865_s27 }
  0x8c   :  { %v2114_v15 = vpop.permute.xlu2 %185 }
  0x8d   :  { %v2116_v16 = vpop.permute.xlu1 %135  ;;  %v2118_v17 = vpop.permute.xlu0 %130 }
  0x90   :  { %902 = vrot.lane.b32.xlu0 %v2121_v19, %s1865_s27 }
  0x94   :  { %v2125_v20 = vpop.permute.xlu2 %200 }
  0x95   :  { %v2127_v21 = vpop.permute.xlu1 %150  ;;  %v2129_v22 = vpop.permute.xlu0 %145  ;;  %v355_v0 = vmul.f32 %v2063_v50, %v2125_v20 }
  0x9c   :  { %v2131_v23 = vpop.permute.xlu2 %215 }
  0x9d   :  { %v2133_v24 = vpop.permute.xlu1 %165  ;;  %v2135_v25 = vpop.permute.xlu0 %160 }
  0xa4   :  { %v271_v26 = vpop.permute.xlu2 %270 }
  0xa5   :  { %v2137_v27 = vpop.permute.xlu1 %180  ;;  %v2139_v28 = vpop.permute.xlu0 %175  ;;  %v532_v45 = vmul.f32 %v2077_v55, %v271_v26  ;;  %v428_v60 = vmul.f32 %v2068_v51, %v271_v26  ;;  %v369_v1 = vmul.f32 %v2063_v50, %v271_v26 }
  0xac   :  { %v2141_v29 = vpop.permute.xlu2 %285 }
  0xad   :  { %v2143_v30 = vpop.permute.xlu1 %195  ;;  %v2145_v31 = vpop.permute.xlu0 %190 }
  0xb4   :  { %v2147_v32 = vpop.permute.xlu2 %225 }
  0xb5   :  { %v2149_v33 = vpop.permute.xlu1 %210  ;;  %v2151_v34 = vpop.permute.xlu0 %205 }
  0xb6   :  { %v415_v61 = vmul.f32 %v2068_v51, %v2151_v34  ;;  %v416_v12 = vmul.f32 %v2068_v51, %v2149_v33  ;;  %v356_v14 = vmul.f32 %v2063_v50, %v2151_v34 }
  0xb8   :  { %v465_v18 = vadd.f32 %v415_v61, %v355_v0  ;;  %v394_v0 = vmul.f32 %v2068_v51, %v2079_v56 }
  0xbc   :  { %v2153_v35 = vpop.permute.xlu2 %255 }
  0xbd   :  { %v366_v36 = vmul.f32 %v2063_v50, %v2153_v35  ;;  %v266_v38 = vpop.permute.xlu1 %265  ;;  %v2157_v39 = vpop.permute.xlu0 %260 }
  0xbe   :  { %v427_v40 = vmul.f32 %v2068_v51, %v266_v38  ;;  %v367_v42 = vmul.f32 %v2063_v50, %v2157_v39  ;;  %v426_v43 = vmul.f32 %v2068_v51, %v2157_v39  ;;  %v531_v49 = vmul.f32 %v2077_v55, %v266_v38 }
  0xbf   :  { %v368_v57 = vmul.f32 %v2063_v50, %v266_v38 }
  0xc0   :  { %v477_v46 = vadd.f32 %v427_v40, %v367_v42  ;;  %v476_v52 = vadd.f32 %v426_v43, %v366_v36  ;;  %v520_v40 = vmul.f32 %v2077_v55, %v2149_v33 }
  0xc1   :  { %v478_v3 = vadd.f32 %v428_v60, %v368_v57 }
  0xc2   :  { %v582_v53 = vadd.f32 %v532_v45, %v477_v46  ;;  %v2167_v58 = vadd.f32 %v531_v49, %v476_v52  ;;  %v466_v45 = vadd.f32 %v416_v12, %v356_v14  ;;  %v570_v52 = vadd.f32 %v520_v40, %v465_v18  ;;  %v1154_v12 = vld [vmem:[%s3299_s3 + $0x10] sm:$0xff] }
  0xc3   :  { %1323 = vmatpush.msra.mxu0 %v1154_v12  ;;  %1799 = vmatpush.msra.mxu3 %v1154_v12 }
  0xc4   :  { %v636_v59 = vadd.f32 %v2087_v62, %v582_v53  ;;  %v521_v53 = vmul.f32 %v2077_v55, %v2131_v23  ;;  %v624_v60 = vadd.f32 %v2087_v62, %v570_v52  ;;  %1798 = vmatpush.msra.mxu2 %v1154_v12  ;;  %1797 = vmatpush.msra.mxu1 %v1154_v12 }
  0xc5   :  { %v276_v63 = vpop.permute.xlu0 %275  ;;  %v2176_v2 = vpop.permute.xlu1 %280 }
  0xc6   :  { %v429_v5 = vmul.f32 %v2068_v51, %v276_v63  ;;  %v533_v7 = vmul.f32 %v2077_v55, %v276_v63  ;;  %v2180_v11 = vmax.f32 %v636_v59, 0.0  ;;  %v534_v36 = vmul.f32 %v2077_v55, %v2176_v2 }
  0xc7   :  { %v571_v61 = vadd.f32 %v521_v53, %v466_v45  ;;  %v72_v53 = vld [vmem:[%s3296_s0 + $0x168] sm:$0xff] }
  0xc8   :  { %v479_v26 = vadd.f32 %v429_v5, %v369_v1  ;;  %v583_v38 = vadd.f32 %v533_v7, %v478_v3  ;;  %822 = vrot.lane.b32.xlu1 %v2180_v11, %s1864_s26  ;;  %v2213_v3 = vmax.f32 %v624_v60, 0.0  ;;  %v334_v7 = vmul.f32 %v2063_v50, %v2058_v48 }
  0xc9   :  { %v625_v5 = vadd.f32 %v2087_v62, %v571_v61  ;;  %v499_v48 = vmul.f32 %v2077_v55, %v2029_v37  ;;  %v535_v61 = vmul.f32 %v2077_v55, %v2141_v29 }
  0xca   :  { %v637_v42 = vadd.f32 %v2087_v62, %v583_v38  ;;  %v584_v43 = vadd.f32 %v534_v36, %v479_v26  ;;  %v444_v14 = vadd.f32 %v394_v0, %v334_v7  ;;  %v1153_v36 = vld [vmem:[%s3299_s3 + $0x8] sm:$0xff]  ;;  %v430_v26 = vmul.f32 %v2068_v51, %v2176_v2 }
  0xcb   :  { %v2225_v18 = vmax.f32 %v625_v5, 0.0  ;;  %1324 = vmatpush.msra.mxu0 %v1153_v36  ;;  %1802 = vmatpush.msra.mxu3 %v1153_v36  ;;  %v370_v38 = vmul.f32 %v2063_v50, %v276_v63 }
  0xcc   :  { %v2195_v49 = vmax.f32 %v637_v42, 0.0  ;;  %v638_v57 = vadd.f32 %v2087_v62, %v584_v43  ;;  %v549_v42 = vadd.f32 %v499_v48, %v444_v14  ;;  %v1152_v43 = vld [vmem:[%s3299_s3] sm:$0xff]  ;;  %1801 = vmatpush.msra.mxu2 %v1153_v36  ;;  %1800 = vmatpush.msra.mxu1 %v1153_v36  ;;  %v357_v36 = vmul.f32 %v2063_v50, %v2149_v33  ;;  %s1872_s3 = smov 40  }
  0xcd   :  { %v2193_v46 = vpop.permute.xlu0 %220  ;;  %1325 = vmatpush.msra.mxu0 %v1152_v43  ;;  %1805 = vmatpush.msra.mxu3 %v1152_v43  ;;  %v59_v48 = vld [vmem:[%s3296_s0 + $0x100] sm:$0xff] }
  0xce   :  { %972 = vrot.lane.b32.xlu2 %v2195_v49, %s1865_s27  ;;  %v2204_v59 = vmax.f32 %v638_v57, 0.0  ;;  %1804 = vmatpush.msra.mxu2 %v1152_v43  ;;  %v480_v57 = vadd.f32 %v430_v26, %v370_v38  ;;  %v603_v60 = vadd.f32 %v2087_v62, %v549_v42  ;;  %v2271_v26 = vpop.permute.xlu1 %290  ;;  %v73_v42 = vld [vmem:[%s3296_s0 + $0x170] sm:$0xff]  ;;  %v359_v10 = vmul.f32 %v2063_v50, %v2193_v46 }
  0xcf   :  { %1803 = vmatpush.msra.mxu1 %v1152_v43  ;;  %v417_v43 = vmul.f32 %v2068_v51, %v2131_v23 }
  0xd0   :  { %752 = vrot.lane.b32.xlu1 %v2110_v13, %s1864_s26  ;;  %974 = vrot.lane.b32.xlu0 %v2204_v59, %s1865_s27  ;;  %v2260_v5 = vmax.f32 %v603_v60, 0.0  ;;  %v585_v7 = vadd.f32 %v535_v61, %v480_v57  ;;  %v335_v60 = vmul.f32 %v2063_v50, %v2079_v56  ;;  %v395_v61 = vmul.f32 %v2068_v51, %v2029_v37 }
  0xd1   :  { %v500_v56 = vmul.f32 %v2077_v55, %v2040_v41 }
  0xd2   :  { %v639_v33 = vadd.f32 %v2087_v62, %v585_v7 }
  0xd4   :  { %v2285_v57 = vmax.f32 %v639_v33, 0.0 }
  0xd5   :  { %v2211_v1 = vpop.permute.xlu0 %295 }
  0xd6   :  { %798 = vrot.lane.b32.xlu2 %v2213_v3, %s1864_s26  ;;  %v374_v45 = vmul.f32 %v2063_v50, %v2211_v1 }
  0xd8   :  { %824 = vrot.lane.b32.xlu1 %v2195_v49, %s1864_s26  ;;  %948 = vrot.lane.b32.xlu0 %v2225_v18, %s1865_s27 }
  0xdd   :  { %v2237_v40 = vpop.permute.xlu0 %300 }
  0xde   :  { %v434_v52 = vmul.f32 %v2068_v51, %v2237_v40  ;;  %754 = vrot.lane.b32.xlu2 %v2121_v19, %s1864_s26  ;;  %v375_v12 = vmul.f32 %v2063_v50, %v2237_v40 }
  0xe0   :  { %v2251_v63 = vadd.f32 %v434_v52, %v374_v45  ;;  %310 = vperm.xlu1 %1825, %v72_v53   ;;  %826 = vrot.lane.b32.xlu0 %v2204_v59, %s1864_s26  ;;  %v522_v45 = vmul.f32 %v2077_v55, %v2193_v46  ;;  %v467_v52 = vadd.f32 %v417_v43, %v357_v36 }
  0xe1   :  { %v371_v43 = vmul.f32 %v2063_v50, %v2176_v2 }
  0xe2   :  { %v572_v53 = vadd.f32 %v522_v45, %v467_v52  ;;  %v431_v52 = vmul.f32 %v2068_v51, %v2141_v29 }
  0xe4   :  { %v626_v7 = vadd.f32 %v2087_v62, %v572_v53  ;;  %v536_v53 = vmul.f32 %v2077_v55, %v2271_v26  ;;  %v481_v2 = vadd.f32 %v431_v52, %v371_v43  ;;  %v501_v43 = vmul.f32 %v2077_v55, %v2101_v9 }
  0xe5   :  { %v2258_v0 = vpop.permute.xlu0 %305 }
  0xe6   :  { %v435_v14 = vmul.f32 %v2068_v51, %v2258_v0  ;;  %904 = vrot.lane.b32.xlu2 %v2260_v5, %s1865_s27  ;;  %v2303_v36 = vmax.f32 %v626_v7, 0.0 }
  0xe8   :  { %v2275_v38 = vadd.f32 %v435_v14, %v375_v12  ;;  %245 = vperm.xlu1 %1825, %v59_v48   ;;  %315 = vperm.xlu0 %1824, %v73_v42   ;;  %v60_v12 = vld [vmem:[%s3296_s0 + $0x108] sm:$0xff]  ;;  %v2296_v14 = vpop.permute.xlu1 %230  ;;  %v445_v48 = vadd.f32 %v395_v61, %v335_v60 }
  0xea   :  { %v550_v42 = vadd.f32 %v500_v56, %v445_v48  ;;  %v396_v48 = vmul.f32 %v2068_v51, %v2040_v41  ;;  %v586_v56 = vadd.f32 %v536_v53, %v481_v2  ;;  %v523_v2 = vmul.f32 %v2077_v55, %v2147_v32 }
  0xec   :  { %v604_v33 = vadd.f32 %v2087_v62, %v550_v42  ;;  %v418_v42 = vmul.f32 %v2068_v51, %v2193_v46 }
  0xee   :  { %976 = vrot.lane.b32.xlu2 %v2285_v57, %s1865_s27 }
  0xf0   :  { %800 = vrot.lane.b32.xlu1 %v2225_v18, %s1864_s26  ;;  %250 = vperm.xlu0 %1824, %v60_v12   ;;  %v336_v12 = vmul.f32 %v2063_v50, %v2029_v37  ;;  %v358_v37 = vmul.f32 %v2063_v50, %v2131_v23  ;;  %v432_v23 = vmul.f32 %v2068_v51, %v2271_v26 }
  0xf2   :  { %v446_v52 = vadd.f32 %v396_v48, %v336_v12  ;;  %v468_v53 = vadd.f32 %v418_v42, %v358_v37  ;;  %v397_v48 = vmul.f32 %v2068_v51, %v2101_v9  ;;  %v537_v42 = vmul.f32 %v2077_v55, %v2211_v1 }
  0xf3   :  { %v337_v37 = vmul.f32 %v2063_v50, %v2040_v41 }
  0xf4   :  { %v573_v12 = vadd.f32 %v523_v2, %v468_v53  ;;  %v502_v2 = vmul.f32 %v2077_v55, %v2099_v8 }
  0xf6   :  { %950 = vrot.lane.b32.xlu2 %v2303_v36, %s1865_s27  ;;  %v627_v53 = vadd.f32 %v2087_v62, %v573_v12  ;;  %v419_v12 = vmul.f32 %v2068_v51, %v2147_v32 }
  0xf8   :  { %v751_v45 = vpop.permute.xlu1 %750  ;;  %756 = vrot.lane.b32.xlu1 %v2260_v5, %s1864_s26  ;;  %802 = vrot.lane.b32.xlu0 %v2303_v36, %s1864_s26  ;;  %v2371_v41 = vmax.f32 %v627_v53, 0.0  ;;  %v538_v53 = vmul.f32 %v2077_v55, %v2237_v40  ;;  %v360_v40 = vmul.f32 %v2063_v50, %v2147_v32  ;;  %v347_v32 = vmul.f32 %v2063_v50, %v2135_v25 }
  0xf9   :  { %v1051_v60 = vsel %vm1050_vm0, 0.0, %v751_v45  ;;  %v2329_v45 = vmax.f32 %v604_v33, 0.0  ;;  %v74_v33 = vld [vmem:[%s3296_s0 + $0x178] sm:$0xff] }
  0xfa   :  { %v901_v61 = vpop.permute.xlu0 %900 }
  0xfb   :  { %v1102_v7 = vsel %vm1101_vm1, %v1051_v60, %v901_v61  ;;  %v640_v60 = vadd.f32 %v2087_v62, %v586_v56  ;;  %v551_v61 = vadd.f32 %v501_v43, %v446_v52  ;;  %v372_v56 = vmul.f32 %v2063_v50, %v2141_v29 }
  0xfc   :  { %1746 = vmatmul.msk.f32.vlgmr.msra.gmra.mxu0 %vm1159_vm2, %v1102_v7 }
  0xfd   :  { %v2347_v7 = vmax.f32 %v640_v60, 0.0  ;;  %v605_v43 = vadd.f32 %v2087_v62, %v551_v61  ;;  %v482_v52 = vadd.f32 %v432_v23, %v372_v56  ;;  %v447_v60 = vadd.f32 %v397_v48, %v337_v37  ;;  %v75_v61 = vld [vmem:[%s3296_s0 + $0x180] sm:$0xff] }
  0xfe   :  { %828 = vrot.lane.b32.xlu2 %v2285_v57, %s1864_s26  ;;  %v524_v48 = vmul.f32 %v2077_v55, %v2296_v14  ;;  %v469_v56 = vadd.f32 %v419_v12, %v359_v10  ;;  %v373_v37 = vmul.f32 %v2063_v50, %v2271_v26  ;;  %v420_v10 = vmul.f32 %v2068_v51, %v2296_v14 }
  0xff   :  { %3318 = vst [vmem:[#allocation5_spill] sm:$0xff] %v2347_v7  ;;  %v2363_v29 = vmax.f32 %v605_v43, 0.0  ;;  %v552_v23 = vadd.f32 %v502_v2, %v447_v60  ;;  %v2392_v2 = vpop.permute.xlu2 %235 }
 0x100   :  { %906 = vrot.lane.b32.xlu1 %v2329_v45, %s1865_s27  ;;  %758 = vrot.lane.b32.xlu0 %v2329_v45, %s1864_s26 }
 0x101   :  { %3319 = vst [vmem:[#allocation6_spill] sm:$0xff] %v2363_v29  ;;  %v606_v43 = vadd.f32 %v2087_v62, %v552_v23 }
 0x106   :  { %320 = vperm.xlu2 %1826, %v74_v33   ;;  %v587_v33 = vadd.f32 %v537_v42, %v482_v52  ;;  %v433_v42 = vmul.f32 %v2068_v51, %v2211_v1  ;;  %v574_v52 = vadd.f32 %v524_v48, %v469_v56  ;;  %v407_v48 = vmul.f32 %v2068_v51, %v2133_v24 }
 0x108   :  { %978 = vrot.lane.b32.xlu1 %v2347_v7, %s1865_s27  ;;  %830 = vrot.lane.b32.xlu0 %v2347_v7, %s1864_s26  ;;  %v641_v46 = vadd.f32 %v2087_v62, %v587_v33  ;;  %v483_v7 = vadd.f32 %v433_v42, %v373_v37  ;;  %v2398_v33 = vmax.f32 %v606_v43, 0.0  ;;  %v628_v26 = vadd.f32 %v2087_v62, %v574_v52 }
 0x109   :  { %v406_v43 = vmul.f32 %v2068_v51, %v2135_v25  ;;  %v457_v37 = vadd.f32 %v407_v48, %v347_v32  ;;  %v511_v32 = vmul.f32 %v2077_v55, %v2133_v24 }
 0x10a   :  { %v2390_v60 = vmax.f32 %v641_v46, 0.0  ;;  %v588_v1 = vadd.f32 %v538_v53, %v483_v7  ;;  %3321 = vst [vmem:[#allocation8_spill] sm:$0xff] %v2398_v33  ;;  %v2407_v23 = vmax.f32 %v628_v26, 0.0  ;;  %v525_v7 = vmul.f32 %v2077_v55, %v2392_v2  ;;  %v2418_v46 = vpop.permute.xlu2 %240 }
 0x10b   :  { %v346_v53 = vmul.f32 %v2063_v50, %v2072_v54  ;;  %v338_v26 = vmul.f32 %v2063_v50, %v2101_v9  ;;  %v503_v9 = vmul.f32 %v2077_v55, %v2048_v44 }
 0x10c   :  { %3320 = vst [vmem:[#allocation7_spill] sm:$0xff] %v2390_v60  ;;  %v642_v12 = vadd.f32 %v2087_v62, %v588_v1  ;;  %v398_v1 = vmul.f32 %v2068_v51, %v2099_v8 }
 0x10e   :  { %908 = vrot.lane.b32.xlu2 %v2363_v29, %s1865_s27  ;;  %v2422_v56 = vmax.f32 %v642_v12, 0.0  ;;  %v448_v48 = vadd.f32 %v398_v1, %v338_v26 }
 0x110   :  { %952 = vrot.lane.b32.xlu1 %v2371_v41, %s1865_s27  ;;  %325 = vperm.xlu0 %1824, %v75_v61   ;;  %v470_v61 = vadd.f32 %v420_v10, %v360_v40  ;;  %3322 = vst [vmem:[#allocation9_spill] sm:$0xff] %v2422_v56  ;;  %v512_v10 = vmul.f32 %v2077_v55, %v2097_v6 }
 0x111   :  { %v456_v40 = vadd.f32 %v406_v43, %v346_v53 }
 0x112   :  { %v575_v42 = vadd.f32 %v525_v7, %v470_v61  ;;  %v562_v7 = vadd.f32 %v512_v10, %v457_v37  ;;  %v76_v37 = vld [vmem:[%s3296_s0 + $0x188] sm:$0xff] }
 0x113   :  { %v561_v53 = vadd.f32 %v511_v32, %v456_v40  ;;  %v339_v40 = vmul.f32 %v2063_v50, %v2099_v8  ;;  %v361_v32 = vmul.f32 %v2063_v50, %v2296_v14  ;;  %v635_v8 = vadd.f32 %v2087_v62, %v2167_v58 }
 0x114   :  { %v629_v52 = vadd.f32 %v2087_v62, %v575_v42  ;;  %v539_v42 = vmul.f32 %v2077_v55, %v2258_v0  ;;  %v616_v43 = vadd.f32 %v2087_v62, %v562_v7  ;;  %v526_v58 = vmul.f32 %v2077_v55, %v2418_v46 }
 0x116   :  { %980 = vrot.lane.b32.xlu2 %v2390_v60, %s1865_s27  ;;  %v2441_v12 = vmax.f32 %v629_v52, 0.0  ;;  %v553_v52 = vadd.f32 %v503_v9, %v448_v48  ;;  %v589_v10 = vadd.f32 %v539_v42, %v2251_v63  ;;  %v2460_v26 = vmax.f32 %v616_v43, 0.0 }
 0x117   :  { %v399_v48 = vmul.f32 %v2068_v51, %v2048_v44  ;;  %v504_v63 = vmul.f32 %v2077_v55, %v2118_v17 }
 0x118   :  { %804 = vrot.lane.b32.xlu1 %v2371_v41, %s1864_s26  ;;  %910 = vrot.lane.b32.xlu0 %v2398_v33, %s1865_s27  ;;  %3323 = vst [vmem:[#allocation10_spill] sm:$0xff] %v2441_v12  ;;  %v607_v7 = vadd.f32 %v2087_v62, %v553_v52  ;;  %v643_v42 = vadd.f32 %v2087_v62, %v589_v10  ;;  %v2489_v10 = vmax.f32 %v635_v8, 0.0 }
 0x119   :  { %v449_v43 = vadd.f32 %v399_v48, %v339_v40  ;;  %v354_v48 = vmul.f32 %v2063_v50, %v2143_v30 }
 0x11a   :  { %v2487_v14 = vmax.f32 %v643_v42, 0.0  ;;  %3325 = vst [vmem:[#allocation12_spill] sm:$0xff] %v2489_v10 }
 0x11e   :  { %954 = vrot.lane.b32.xlu2 %v2407_v23, %s1865_s27 }
 0x120   :  { %760 = vrot.lane.b32.xlu1 %v2363_v29, %s1864_s26  ;;  %982 = vrot.lane.b32.xlu0 %v2422_v56, %s1865_s27 }
 0x126   :  { %806 = vrot.lane.b32.xlu2 %v2407_v23, %s1864_s26 }
 0x128   :  { %v973_v61 = vpop.permute.xlu2 %972  ;;  %832 = vrot.lane.b32.xlu1 %v2390_v60, %s1864_s26  ;;  %956 = vrot.lane.b32.xlu0 %v2441_v12, %s1865_s27  ;;  %v615_v60 = vadd.f32 %v2087_v62, %v561_v53  ;;  %v421_v53 = vmul.f32 %v2068_v51, %v2392_v2 }
 0x12a   :  { %v2474_v9 = vmax.f32 %v615_v60, 0.0  ;;  %v471_v52 = vadd.f32 %v421_v53, %v361_v32  ;;  %v554_v60 = vadd.f32 %v504_v63, %v449_v43  ;;  %v903_v32 = vpop.permute.xlu0 %902  ;;  %v414_v43 = vmul.f32 %v2068_v51, %v2125_v20 }
 0x12b   :  { %v348_v53 = vmul.f32 %v2063_v50, %v2133_v24 }
 0x12c   :  { %3324 = vst [vmem:[#allocation11_spill] sm:$0xff] %v2474_v9  ;;  %v608_v63 = vadd.f32 %v2087_v62, %v554_v60  ;;  %v576_v8 = vadd.f32 %v526_v58, %v471_v52  ;;  %v513_v52 = vmul.f32 %v2077_v55, %v2139_v28  ;;  %v464_v60 = vadd.f32 %v414_v43, %v354_v48 }
 0x12e   :  { %762 = vrot.lane.b32.xlu2 %v2398_v33, %s1864_s26  ;;  %v630_v24 = vadd.f32 %v2087_v62, %v576_v8 }
 0x130   :  { %v2458_v1 = vpop.permute.xlu2 %798  ;;  %385 = vperm.xlu1 %1825, %v76_v37   ;;  %930 = vrot.lane.b32.xlu0 %v2460_v26, %s1865_s27  ;;  %v2483_v37 = vmax.f32 %v607_v7, 0.0  ;;  %v2525_v43 = vmax.f32 %v630_v24, 0.0 }
 0x136   :  { %780 = vrot.lane.b32.xlu2 %v2474_v9, %s1864_s26  ;;  %v3327_v9 = vmax.f32 %v2095_v4, 0.0 }
 0x138   :  { %v755_v33 = vpop.permute.xlu2 %754  ;;  %912 = vrot.lane.b32.xlu1 %v2483_v37, %s1865_s27  ;;  %984 = vrot.lane.b32.xlu0 %v2487_v14, %s1865_s27 }
 0x13a   :  { %v823_v40 = vpop.permute.xlu1 %822 }
 0x13b   :  { %v1087_v7 = vsel %vm1050_vm0, %v2489_v10, %v823_v40  ;;  %v519_v40 = vmul.f32 %v2077_v55, %v2151_v34 }
 0x13c   :  { %v1138_v42 = vsel %vm1101_vm1, %v1087_v7, %v973_v61  ;;  %v408_v61 = vmul.f32 %v2068_v51, %v2097_v6  ;;  %v2516_v7 = vmax.f32 %v608_v63, 0.0 }
 0x13d   :  { %1782 = vmatmul.msk.f32.vlgmr.msra.gmra.mxu3 %vm1159_vm2, %v1138_v42  ;;  %v569_v34 = vadd.f32 %v519_v40, %v464_v60 }
 0x13e   :  { %808 = vrot.lane.b32.xlu2 %v2441_v12, %s1864_s26  ;;  %3326 = vst [vmem:[#allocation13_spill] sm:$0xff] %v2516_v7  ;;  %v458_v42 = vadd.f32 %v408_v61, %v348_v53 }
 0x13f   :  { %v623_v63 = vadd.f32 %v2087_v62, %v569_v34 }
 0x140   :  { %v905_v58 = vpop.permute.xlu2 %904  ;;  %834 = vrot.lane.b32.xlu1 %v2422_v56, %s1864_s26  ;;  %914 = vrot.lane.b32.xlu0 %v2516_v7, %s1865_s27  ;;  %v563_v56 = vadd.f32 %v513_v52, %v458_v42 }
 0x142   :  { %v753_v12 = vpop.permute.xlu1 %752  ;;  %v975_v29 = vpop.permute.xlu0 %974  ;;  %v617_v4 = vadd.f32 %v2087_v62, %v563_v56 }
 0x143   :  { %v1052_v10 = vsel %vm1050_vm0, %v3327_v9, %v753_v12  ;;  %v2534_v12 = vmax.f32 %v623_v63, 0.0 }
 0x144   :  { %v1103_v48 = vsel %vm1101_vm1, %v1052_v10, %v903_v32  ;;  %v1053_v10 = vsel %vm1050_vm0, %v2110_v13, %v755_v33  ;;  %v2547_v52 = vmax.f32 %v617_v4, 0.0  ;;  %v422_v4 = vmul.f32 %v2068_v51, %v2418_v46 }
 0x145   :  { %1747 = vmatmul.msk.f32.gmra.mxu0 %vm1159_vm2, %v1103_v48  ;;  %v1075_v53 = vsel %vm1050_vm0, %v2534_v12, %v2458_v1  ;;  %v1104_v61 = vsel %vm1101_vm1, %v1053_v10, %v905_v58  ;;  %v340_v58 = vmul.f32 %v2063_v50, %v2048_v44  ;;  %v505_v10 = vmul.f32 %v2077_v55, %v2116_v16 }
 0x146   :  { %958 = vrot.lane.b32.xlu2 %v2525_v43, %s1865_s27  ;;  %3328 = vst [vmem:[#allocation14_spill] sm:$0xff] %v2547_v52  ;;  %v409_v44 = vmul.f32 %v2068_v51, %v2139_v28 }
 0x148   :  { %v977_v8 = vpop.permute.xlu2 %976  ;;  %764 = vrot.lane.b32.xlu1 %v2483_v37, %s1864_s26  ;;  %836 = vrot.lane.b32.xlu0 %v2487_v14, %s1864_s26 }
 0x14a   :  { %v825_v9 = vpop.permute.xlu1 %824  ;;  %v949_v40 = vpop.permute.xlu0 %948 }
 0x14b   :  { %v1088_v32 = vsel %vm1050_vm0, %v2180_v11, %v825_v9  ;;  %v1126_v60 = vsel %vm1101_vm1, %v1075_v53, %v949_v40 }
 0x14c   :  { %v1139_v56 = vsel %vm1101_vm1, %v1088_v32, %v975_v29  ;;  %1770 = vmatmul.msk.f32.vlgmr.msra.gmra.mxu2 %vm1159_vm2, %v1126_v60  ;;  %v400_v29 = vmul.f32 %v2068_v51, %v2118_v17  ;;  %v349_v32 = vmul.f32 %v2063_v50, %v2097_v6  ;;  %v514_v6 = vmul.f32 %v2077_v55, %v2137_v27 }
 0x14d   :  { %1748 = vmatmul.msk.f32.gmra.mxu0 %vm1159_vm2, %v1104_v61  ;;  %1783 = vmatmul.msk.f32.gmra.mxu3 %vm1159_vm2, %v1139_v56 }
 0x14e   :  { %932 = vrot.lane.b32.xlu2 %v2547_v52, %s1865_s27  ;;  %v450_v48 = vadd.f32 %v400_v29, %v340_v58  ;;  %v459_v60 = vadd.f32 %v409_v44, %v349_v32  ;;  %v363_v44 = vmul.f32 %v2063_v50, %v2418_v46 }
 0x150   :  { %v951_v13 = vpop.permute.xlu2 %950  ;;  %782 = vrot.lane.b32.xlu1 %v2460_v26, %s1864_s26  ;;  %766 = vrot.lane.b32.xlu0 %v2516_v7, %s1864_s26  ;;  %v555_v40 = vadd.f32 %v505_v10, %v450_v48 }
 0x152   :  { %v2561_v33 = vpop.permute.xlu1 %310  ;;  %v827_v24 = vpop.permute.xlu0 %826 }
 0x153   :  { %v540_v1 = vmul.f32 %v2077_v55, %v2561_v33  ;;  %v1089_v34 = vsel %vm1050_vm0, %v2195_v49, %v827_v24  ;;  %v362_v49 = vmul.f32 %v2063_v50, %v2392_v2 }
 0x154   :  { %v1140_v63 = vsel %vm1101_vm1, %v1089_v34, %v977_v8 }
 0x155   :  { %v590_v42 = vadd.f32 %v540_v1, %v2275_v38  ;;  %1784 = vmatmul.msk.f32.gmra.mxu3 %vm1159_vm2, %v1140_v63  ;;  %v472_v61 = vadd.f32 %v422_v4, %v362_v49  ;;  %v609_v1 = vadd.f32 %v2087_v62, %v555_v40  ;;  %v410_v63 = vmul.f32 %v2068_v51, %v2137_v27 }
 0x156   :  { %v350_v4 = vmul.f32 %v2063_v50, %v2139_v28  ;;  %v436_v49 = vmul.f32 %v2068_v51, %v2561_v33  ;;  %v425_v28 = vmul.f32 %v2068_v51, %v2153_v35  ;;  %v376_v40 = vmul.f32 %v2063_v50, %v2258_v0 }
 0x157   :  { %v644_v9 = vadd.f32 %v2087_v62, %v590_v42  ;;  %v564_v42 = vadd.f32 %v514_v6, %v459_v60  ;;  %v2613_v10 = vmax.f32 %v609_v1, 0.0  ;;  %v530_v0 = vmul.f32 %v2077_v55, %v2157_v39 }
 0x158   :  { %v2579_v38 = vpop.permute.xlu2 %828  ;;  %810 = vrot.lane.b32.xlu1 %v2525_v43, %s1864_s26  ;;  %784 = vrot.lane.b32.xlu0 %v2547_v52, %s1864_s26 }
 0x159   :  { %v2585_v8 = vmax.f32 %v644_v9, 0.0 }
 0x15a   :  { %v2591_v53 = vpop.permute.xlu1 %245  ;;  %v2597_v2 = vpop.permute.xlu0 %315 }
 0x15b   :  { %v527_v56 = vmul.f32 %v2077_v55, %v2591_v53  ;;  %986 = vrot.lane.b32.xlu2 %v2585_v8, %s1865_s27  ;;  %v423_v34 = vmul.f32 %v2068_v51, %v2591_v53 }
 0x15d   :  { %v577_v29 = vadd.f32 %v527_v56, %v472_v61  ;;  %v618_v56 = vadd.f32 %v2087_v62, %v564_v42  ;;  %v473_v60 = vadd.f32 %v423_v34, %v363_v44  ;;  %v401_v42 = vmul.f32 %v2068_v51, %v2116_v16 }
 0x15e   :  { %v341_v34 = vmul.f32 %v2063_v50, %v2118_v17 }
 0x15f   :  { %v631_v58 = vadd.f32 %v2087_v62, %v577_v29  ;;  %v541_v29 = vmul.f32 %v2077_v55, %v2597_v2 }
 0x160   :  { %v2603_v24 = vpop.permute.xlu2 %320  ;;  %v451_v17 = vadd.f32 %v401_v42, %v341_v34 }
 0x161   :  { %v2607_v48 = vmax.f32 %v631_v58, 0.0  ;;  %v460_v58 = vadd.f32 %v410_v63, %v350_v4 }
 0x162   :  { %v801_v9 = vpop.permute.xlu1 %800  ;;  %v251_v61 = vpop.permute.xlu0 %250 }
 0x163   :  { %3329 = vst [vmem:[#allocation15_spill] sm:$0xff] %v2607_v48  ;;  %v1076_v32 = vsel %vm1050_vm0, %v2213_v3, %v801_v9  ;;  %960 = vrot.lane.b32.xlu1 %v2607_v48, %s1865_s27  ;;  %812 = vrot.lane.b32.xlu0 %v2607_v48, %s1864_s26  ;;  %v365_v6 = vmul.f32 %v2063_v50, %v251_v61  ;;  %v2646_v48 = vmax.f32 %v618_v56, 0.0 }
 0x164   :  { %916 = vrot.lane.b32.xlu2 %v2613_v10, %s1865_s27  ;;  %v1127_v46 = vsel %vm1101_vm1, %v1076_v32, %v951_v13  ;;  %v528_v1 = vmul.f32 %v2077_v55, %v251_v61  ;;  %v486_v9 = vadd.f32 %v436_v49, %v376_v40  ;;  %v515_v13 = vmul.f32 %v2077_v55, %v2114_v15 }
 0x165   :  { %1771 = vmatmul.msk.f32.gmra.mxu2 %vm1159_vm2, %v1127_v46  ;;  %v475_v7 = vadd.f32 %v425_v28, %v365_v6  ;;  %v437_v46 = vmul.f32 %v2068_v51, %v2597_v2  ;;  %v377_v56 = vmul.f32 %v2063_v50, %v2561_v33 }
 0x166   :  { %v578_v52 = vadd.f32 %v528_v1, %v473_v60  ;;  %v591_v32 = vadd.f32 %v541_v29, %v486_v9  ;;  %v565_v28 = vadd.f32 %v515_v13, %v460_v58  ;;  %v542_v60 = vmul.f32 %v2077_v55, %v2603_v24 }
 0x167   :  { %v2649_v4 = vadd.f32 %v530_v0, %v475_v7  ;;  %v487_v1 = vadd.f32 %v437_v46, %v377_v56 }
 0x168   :  { %v909_v44 = vpop.permute.xlu2 %908  ;;  %v632_v63 = vadd.f32 %v2087_v62, %v578_v52  ;;  %v645_v7 = vadd.f32 %v2087_v62, %v591_v32  ;;  %v506_v52 = vmul.f32 %v2077_v55, %v2056_v47  ;;  %v619_v29 = vadd.f32 %v2087_v62, %v565_v28 }
 0x169   :  { %v592_v42 = vadd.f32 %v542_v60, %v487_v1  ;;  %v507_v28 = vmul.f32 %v2077_v55, %v2129_v22  ;;  %v424_v60 = vmul.f32 %v2068_v51, %v251_v61  ;;  %v529_v61 = vmul.f32 %v2077_v55, %v2153_v35 }
 0x16a   :  { %v757_v39 = vpop.permute.xlu1 %756  ;;  %v2653_v49 = vmax.f32 %v632_v63, 0.0  ;;  %v803_v40 = vpop.permute.xlu0 %802  ;;  %v2669_v58 = vmax.f32 %v645_v7, 0.0  ;;  %v556_v0 = vadd.f32 %v506_v52, %v451_v17  ;;  %v2675_v34 = vmax.f32 %v619_v29, 0.0 }
 0x16b   :  { %934 = vrot.lane.b32.xlu1 %v2646_v48, %s1865_s27  ;;  %v1054_v9 = vsel %vm1050_vm0, %v2121_v19, %v757_v39  ;;  %v342_v63 = vmul.f32 %v2063_v50, %v2116_v16  ;;  %v402_v39 = vmul.f32 %v2068_v51, %v2056_v47  ;;  %v646_v17 = vadd.f32 %v2087_v62, %v592_v42 }
 0x16c   :  { %838 = vrot.lane.b32.xlu2 %v2585_v8, %s1864_s26  ;;  %962 = vrot.lane.b32.xlu0 %v2653_v49, %s1865_s27  ;;  %v610_v19 = vadd.f32 %v2087_v62, %v556_v0  ;;  %v1090_v16 = vsel %vm1050_vm0, %v2204_v59, %v2579_v38  ;;  %v351_v35 = vmul.f32 %v2063_v50, %v2137_v27 }
 0x16d   :  { %v452_v52 = vadd.f32 %v402_v39, %v342_v63  ;;  %v2701_v1 = vmax.f32 %v646_v17, 0.0 }
 0x16e   :  { %v2693_v56 = vmax.f32 %v610_v19, 0.0 }
 0x170   :  { %v981_v6 = vpop.permute.xlu2 %980 }
 0x172   :  { %v907_v13 = vpop.permute.xlu1 %906  ;;  %v759_v32 = vpop.permute.xlu0 %758 }
 0x173   :  { %988 = vrot.lane.b32.xlu1 %v2669_v58, %s1865_s27  ;;  %v1105_v33 = vsel %vm1101_vm1, %v1054_v9, %v907_v13  ;;  %v1055_v46 = vsel %vm1050_vm0, %v2260_v5, %v759_v32  ;;  %v557_v9 = vadd.f32 %v507_v28, %v452_v52  ;;  %v364_v13 = vmul.f32 %v2063_v50, %v2591_v53 }
 0x174   :  { %768 = vrot.lane.b32.xlu2 %v2613_v10, %s1864_s26  ;;  %1749 = vmatmul.msk.f32.gmra.mxu0 %vm1159_vm2, %v1105_v33  ;;  %v1106_v0 = vsel %vm1101_vm1, %v1055_v46, %v909_v44  ;;  %v1077_v33 = vsel %vm1050_vm0, %v2225_v18, %v803_v40  ;;  %v516_v50 = vmul.f32 %v2077_v55, %v2145_v31 }
 0x175   :  { %936 = vrot.lane.b32.xlu0 %v2675_v34, %s1865_s27  ;;  %v474_v59 = vadd.f32 %v424_v60, %v364_v13  ;;  %v611_v38 = vadd.f32 %v2087_v62, %v557_v9  ;;  %v438_v60 = vmul.f32 %v2068_v51, %v2603_v24 }
 0x177   :  { %v579_v63 = vadd.f32 %v529_v61, %v474_v59  ;;  %v2724_v19 = vmax.f32 %v611_v38, 0.0 }
 0x178   :  { %v955_v7 = vpop.permute.xlu2 %954 }
 0x179   :  { %v633_v27 = vadd.f32 %v2087_v62, %v579_v63 }
 0x17a   :  { %v979_v29 = vpop.permute.xlu1 %978  ;;  %v831_v42 = vpop.permute.xlu0 %830 }
 0x17b   :  { %918 = vrot.lane.b32.xlu1 %v2693_v56, %s1865_s27  ;;  %v1141_v5 = vsel %vm1101_vm1, %v1090_v16, %v979_v29  ;;  %v1091_v53 = vsel %vm1050_vm0, %v2285_v57, %v831_v42  ;;  %v411_v57 = vmul.f32 %v2068_v51, %v2114_v15  ;;  %v2745_v52 = vmax.f32 %v633_v27, 0.0  ;;  %v2772_v42 = vld [vmem:[%s3297_s1 + $0x1] ss:$0 sm:$0xff] }
 0x17c   :  { %786 = vrot.lane.b32.xlu2 %v2646_v48, %s1864_s26  ;;  %1750 = vmatmul.msk.f32.gmra.mxu0 %vm1159_vm2, %v1106_v0  ;;  %v1142_v18 = vsel %vm1101_vm1, %v1091_v53, %v981_v6  ;;  %v403_v59 = vmul.f32 %v2772_v42, %v2129_v22  ;;  %v412_v27 = vmul.f32 %v2772_v42, %v2145_v31 }
 0x17d   :  { %990 = vrot.lane.b32.xlu0 %v2701_v1, %s1865_s27  ;;  %1785 = vmatmul.msk.f32.gmra.mxu3 %vm1159_vm2, %v1141_v5  ;;  %v461_v40 = vadd.f32 %v411_v57, %v351_v35  ;;  %v2804_v35 = vld [vmem:[%s3298_s2] ss:$0 sm:$0xff] }
 0x17f   :  { %v566_v6 = vadd.f32 %v516_v50, %v461_v40 }
 0x180   :  { %v2716_v44 = vpop.permute.xlu2 %806 }
 0x181   :  { %v620_v9 = vadd.f32 %v2087_v62, %v566_v6 }
 0x182   :  { %v953_v32 = vpop.permute.xlu1 %952  ;;  %v2729_v28 = vpop.permute.xlu0 %325 }
 0x183   :  { %840 = vrot.lane.b32.xlu1 %v2669_v58, %s1864_s26  ;;  %v1128_v39 = vsel %vm1101_vm1, %v1077_v33, %v953_v32  ;;  %v543_v51 = vmul.f32 %v2077_v55, %v2729_v28  ;;  %v2776_v53 = vmax.f32 %v620_v9, 0.0 }
 0x184   :  { %814 = vrot.lane.b32.xlu2 %v2653_v49, %s1864_s26  ;;  %1772 = vmatmul.msk.f32.gmra.mxu2 %vm1159_vm2, %v1128_v39 }
 0x185   :  { %920 = vrot.lane.b32.xlu0 %v2724_v19, %s1865_s27  ;;  %1786 = vmatmul.msk.f32.gmra.mxu3 %vm1159_vm2, %v1142_v18 }
 0x188   :  { %v2743_v17 = vpop.permute.xlu2 %762 }
 0x18a   :  { %v805_v46 = vpop.permute.xlu1 %804  ;;  %v911_v29 = vpop.permute.xlu0 %910 }
 0x18b   :  { %v1078_v16 = vsel %vm1050_vm0, %v2303_v36, %v805_v46  ;;  %770 = vrot.lane.b32.xlu1 %v2693_v56, %s1864_s26  ;;  %v2762_v36 = vld [vmem:[%s3297_s1] ss:$0 sm:$0xff] }
 0x18c   :  { %964 = vrot.lane.b32.xlu2 %v2745_v52, %s1865_s27  ;;  %v1129_v0 = vsel %vm1101_vm1, %v1078_v16, %v955_v7  ;;  %v378_v5 = vmul.f32 %v2762_v36, %v2597_v2  ;;  %v343_v55 = vmul.f32 %v2762_v36, %v2056_v47  ;;  %v345_v62 = vmul.f32 %v2762_v36, %v2127_v21  ;;  %v2797_v47 = vld [vmem:[%s3297_s1 + $0x2] ss:$0 sm:$0xff] }
 0x18d   :  { %842 = vrot.lane.b32.xlu0 %v2701_v1, %s1864_s26  ;;  %1773 = vmatmul.msk.f32.gmra.mxu2 %vm1159_vm2, %v1129_v0  ;;  %v510_v39 = vmul.f32 %v2797_v47, %v2135_v25  ;;  %v508_v50 = vmul.f32 %v2797_v47, %v2127_v21  ;;  %v352_v46 = vmul.f32 %v2762_v36, %v2114_v15 }
 0x18e   :  { %v488_v13 = vadd.f32 %v438_v60, %v378_v5  ;;  %v453_v63 = vadd.f32 %v403_v59, %v343_v55  ;;  %v634_v59 = vadd.f32 %v2804_v35, %v2649_v4  ;;  %v413_v4 = vmul.f32 %v2772_v42, %v2143_v30 }
 0x18f   :  { %v462_v5 = vadd.f32 %v412_v27, %v352_v46  ;;  %v518_v46 = vmul.f32 %v2797_v47, %v2125_v20 }
 0x190   :  { %v781_v7 = vpop.permute.xlu2 %780  ;;  %v593_v38 = vadd.f32 %v543_v51, %v488_v13  ;;  %v558_v60 = vadd.f32 %v508_v50, %v453_v63  ;;  %v1079_v51 = vsel %vm1050_vm0, %v2371_v41, %v2716_v44  ;;  %v439_v63 = vmul.f32 %v2772_v42, %v2729_v28 }
 0x192   :  { %v761_v61 = vpop.permute.xlu1 %760  ;;  %v983_v33 = vpop.permute.xlu0 %982  ;;  %v647_v18 = vadd.f32 %v2804_v35, %v593_v38  ;;  %v517_v38 = vmul.f32 %v2797_v47, %v2143_v30  ;;  %v612_v44 = vadd.f32 %v2804_v35, %v558_v60 }
 0x193   :  { %v1056_v2 = vsel %vm1050_vm0, %v2329_v45, %v761_v61  ;;  %788 = vrot.lane.b32.xlu1 %v2675_v34, %s1864_s26  ;;  %v405_v45 = vmul.f32 %v2772_v42, %v2072_v54 }
 0x194   :  { %938 = vrot.lane.b32.xlu2 %v2776_v53, %s1865_s27  ;;  %v1107_v32 = vsel %vm1101_vm1, %v1056_v2, %v911_v29  ;;  %v2813_v16 = vmax.f32 %v647_v18, 0.0  ;;  %v3330_v29 = vld [vmem:[#allocation5_spill] sm:$0xff]  ;;  %v567_v61 = vadd.f32 %v517_v38, %v462_v5  ;;  %v2836_v2 = vmax.f32 %v634_v59, 0.0 }
 0x195   :  { %772 = vrot.lane.b32.xlu0 %v2724_v19, %s1864_s26  ;;  %1751 = vmatmul.msk.f32.gmra.mxu0 %vm1159_vm2, %v1107_v32  ;;  %v455_v57 = vadd.f32 %v405_v45, %v345_v62  ;;  %v2840_v32 = vmax.f32 %v612_v44, 0.0  ;;  %v353_v45 = vmul.f32 %v2762_v36, %v2145_v31  ;;  %v379_v31 = vmul.f32 %v2762_v36, %v2603_v24 }
 0x196   :  { %v621_v30 = vadd.f32 %v2804_v35, %v567_v61  ;;  %v404_v24 = vmul.f32 %v2772_v42, %v2127_v21  ;;  %v509_v59 = vmul.f32 %v2797_v47, %v2072_v54  ;;  %v545_v38 = vmul.f32 0.0, %v2797_v47 }
 0x197   :  { %v560_v6 = vadd.f32 %v510_v39, %v455_v57 }
 0x198   :  { %v809_v40 = vpop.permute.xlu2 %808  ;;  %v2872_v60 = vmax.f32 %v621_v30, 0.0 }
 0x199   :  { %v614_v41 = vadd.f32 %v2804_v35, %v560_v6  ;;  %v1080_v18 = vsel %vm1050_vm0, %v2407_v23, %v809_v40  ;;  %v463_v23 = vadd.f32 %v413_v4, %v353_v45  ;;  %v489_v40 = vadd.f32 %v439_v63, %v379_v31  ;;  %v3334_v31 = vld [vmem:[#allocation8_spill] sm:$0xff] }
 0x19a   :  { %v833_v25 = vpop.permute.xlu1 %832  ;;  %v957_v9 = vpop.permute.xlu0 %956  ;;  %v344_v6 = vmul.f32 %v2762_v36, %v2129_v22 }
 0x19b   :  { %v1092_v0 = vsel %vm1050_vm0, %v3330_v29, %v833_v25  ;;  %816 = vrot.lane.b32.xlu1 %v2745_v52, %s1864_s26  ;;  %v1130_v13 = vsel %vm1101_vm1, %v1079_v51, %v957_v9  ;;  %v2838_v55 = vmax.f32 %v614_v41, 0.0  ;;  %v3331_v29 = vld [vmem:[#allocation6_spill] sm:$0xff]  ;;  %v568_v9 = vadd.f32 %v518_v46, %v463_v23 }
 0x19c   :  { %992 = vrot.lane.b32.xlu2 %v2813_v16, %s1865_s27  ;;  %v1143_v15 = vsel %vm1101_vm1, %v1092_v0, %v983_v33  ;;  %1774 = vmatmul.msk.f32.gmra.mxu2 %vm1159_vm2, %v1130_v13  ;;  %v1057_v0 = vsel %vm1050_vm0, %v3331_v29, %v2743_v17  ;;  %v454_v22 = vadd.f32 %v404_v24, %v344_v6  ;;  %v3332_v13 = vld [vmem:[#allocation12_spill] sm:$0xff] }
 0x19d   :  { %790 = vrot.lane.b32.xlu0 %v2776_v53, %s1864_s26  ;;  %1787 = vmatmul.msk.f32.gmra.mxu3 %vm1159_vm2, %v1143_v15  ;;  %v1066_v39 = vsel %vm1050_vm0, %v2838_v55, %v781_v7  ;;  %v380_v15 = vmul.f32 %v2762_v36, %v2729_v28  ;;  %v622_v44 = vadd.f32 %v2804_v35, %v568_v9  ;;  %v3333_v28 = vld [vmem:[#allocation7_spill] sm:$0xff] }
 0x19f   :  { %v2897_v45 = vmax.f32 %v622_v44, 0.0 }
 0x1a0   :  { %v959_v62 = vpop.permute.xlu2 %958 }
 0x1a1   :  { %v1131_v7 = vsel %vm1101_vm1, %v1080_v18, %v959_v62  ;;  %v559_v62 = vadd.f32 %v509_v59, %v454_v22 }
 0x1a2   :  { %v386_v33 = vpop.permute.xlu1 %385  ;;  %v931_v57 = vpop.permute.xlu0 %930 }
 0x1a3   :  { %966 = vrot.lane.b32.xlu1 %v2836_v2, %s1865_s27  ;;  %v544_v50 = vmul.f32 %v2797_v47, %v386_v33  ;;  %v1117_v27 = vsel %vm1101_vm1, %v1066_v39, %v931_v57  ;;  %v440_v51 = vmul.f32 %v2772_v42, %v386_v33  ;;  %v613_v39 = vadd.f32 %v2804_v35, %v559_v62 }
 0x1a4   :  { %922 = vrot.lane.b32.xlu2 %v2840_v32, %s1865_s27  ;;  %1761 = vmatmul.msk.f32.vlgmr.msra.gmra.mxu1 %vm1159_vm2, %v1117_v27 }
 0x1a5   :  { %818 = vrot.lane.b32.xlu0 %v2836_v2, %s1864_s26  ;;  %1775 = vmatmul.msk.f32.gmra.mxu2 %vm1159_vm2, %v1131_v7  ;;  %v594_v25 = vadd.f32 %v544_v50, %v489_v40  ;;  %v490_v41 = vadd.f32 %v440_v51, %v380_v15  ;;  %v2909_v57 = vmax.f32 %v613_v39, 0.0  ;;  %v3335_v40 = vld [vmem:[#allocation9_spill] sm:$0xff]  ;;  %v3337_v15 = vld [vmem:[#allocation10_spill] sm:$0xff] }
 0x1a7   :  { %v648_v42 = vadd.f32 %v2804_v35, %v594_v25  ;;  %v595_v4 = vadd.f32 %v545_v38, %v490_v41  ;;  %v3336_v25 = vld [vmem:[#allocation11_spill] sm:$0xff]  ;;  %v2952_v38 = vpop.f32.mrf.mxu0  ;;  %v1866_v41 = vmov 0.0  }
 0x1a8   :  { %v933_v17 = vpop.permute.xlu2 %932 }
 0x1a9   :  { %v2893_v61 = vmax.f32 %v648_v42, 0.0  ;;  %v649_v18 = vadd.f32 %v2804_v35, %v595_v4 }
 0x1aa   :  { %v913_v5 = vpop.permute.xlu1 %912  ;;  %v985_v21 = vpop.permute.xlu0 %984 }
 0x1ab   :  { %940 = vrot.lane.b32.xlu1 %v2872_v60, %s1865_s27  ;;  %v1108_v20 = vsel %vm1101_vm1, %v1057_v0, %v913_v5  ;;  %v699_v27 = vmax.f32 %v649_v18, 0.0 }
 0x1ac   :  { %844 = vrot.lane.b32.xlu2 %v2813_v16, %s1864_s26  ;;  %1752 = vmatmul.msk.f32.gmra.mxu0 %vm1159_vm2, %v1108_v20 }
 0x1ad   :  { %968 = vrot.lane.b32.xlu0 %v3332_v13, %s1865_s27 }
 0x1b2   :  { %v835_v33 = vpop.permute.xlu1 %834  ;;  %v915_v63 = vpop.permute.xlu0 %914 }
 0x1b3   :  { %v1093_v36 = vsel %vm1050_vm0, %v3333_v28, %v835_v33  ;;  %994 = vrot.lane.b32.xlu1 %v2893_v61, %s1865_s27 }
 0x1b4   :  { %774 = vrot.lane.b32.xlu2 %v2840_v32, %s1864_s26  ;;  %v1144_v54 = vsel %vm1101_vm1, %v1093_v36, %v985_v21 }
 0x1b5   :  { %942 = vrot.lane.b32.xlu0 %v2897_v45, %s1865_s27  ;;  %v987_v47 = vpop.permute.xlu2 %986  ;;  %1788 = vmatmul.msk.f32.gmra.mxu3 %vm1159_vm2, %v1144_v54 }
 0x1ba   :  { %v765_v30 = vpop.permute.xlu1 %764  ;;  %v837_v7 = vpop.permute.xlu0 %836 }
 0x1bb   :  { %v1058_v50 = vsel %vm1050_vm0, %v3334_v31, %v765_v30  ;;  %924 = vrot.lane.b32.xlu1 %v2909_v57, %s1865_s27  ;;  %v1094_v46 = vsel %vm1050_vm0, %v3335_v40, %v837_v7 }
 0x1bc   :  { %792 = vrot.lane.b32.xlu2 %v2872_v60, %s1864_s26  ;;  %v1109_v23 = vsel %vm1101_vm1, %v1058_v50, %v915_v63  ;;  %v1145_v24 = vsel %vm1101_vm1, %v1094_v46, %v987_v47  ;;  %v2980_v50 = vld [vmem:[%s3300_s4] ss:$0 sm:$0xff]  ;;  %s1867_s4 = smov 24  }
 0x1bd   :  { %996 = vrot.lane.b32.xlu0 %v699_v27, %s1865_s27  ;;  %1753 = vmatmul.msk.f32.gmra.mxu0 %vm1159_vm2, %v1109_v23 }
 0x1be   :  { %v917_v35 = vpop.permute.xlu2 %916  ;;  %1789 = vmatmul.msk.f32.gmra.mxu3 %vm1159_vm2, %v1145_v24 }
 0x1c0   :  { %v1435_v39 = vpop.f32.mrf.mxu3 }
 0x1c2   :  { %v783_v6 = vpop.permute.xlu1 %782  ;;  %v767_v0 = vpop.permute.xlu0 %766 }
 0x1c3   :  { %v1067_v29 = vsel %vm1050_vm0, %v3336_v25, %v783_v6  ;;  %846 = vrot.lane.b32.xlu1 %v2893_v61, %s1864_s26  ;;  %v1059_v51 = vsel %vm1050_vm0, %v2483_v37, %v767_v0  ;;  %v2961_v28 = vpop.f32.mrf.mxu0  ;;  %v3340_v6 = vld [vmem:[#allocation13_spill] sm:$0xff] }
 0x1c4   :  { %820 = vrot.lane.b32.xlu2 %v3332_v13, %s1864_s26  ;;  %v1118_v5 = vsel %vm1101_vm1, %v1067_v29, %v933_v17  ;;  %v1110_v9 = vsel %vm1101_vm1, %v1059_v51, %v917_v35 }
 0x1c5   :  { %926 = vrot.lane.b32.xlu0 %v2838_v55, %s1865_s27  ;;  %1762 = vmatmul.msk.f32.gmra.mxu1 %vm1159_vm2, %v1118_v5 }
 0x1c6   :  { %v839_v20 = vpop.permute.xlu2 %838  ;;  %1754 = vmatmul.msk.f32.gmra.mxu0 %vm1159_vm2, %v1110_v9 }
 0x1ca   :  { %v811_v21 = vpop.permute.xlu1 %810  ;;  %v785_v22 = vpop.permute.xlu0 %784 }
 0x1cb   :  { %776 = vrot.lane.b32.xlu1 %v2909_v57, %s1864_s26  ;;  %v1081_v17 = vsel %vm1050_vm0, %v3337_v15, %v811_v21  ;;  %v1068_v44 = vsel %vm1050_vm0, %v2460_v26, %v785_v22  ;;  %v1095_v26 = vsel %vm1050_vm0, %v2487_v14, %v839_v20  ;;  %v1333_v40 = vpop.f32.mrf.mxu0 }
 0x1cc   :  { %970 = vrot.lane.b32.xlu2 %v2180_v11, %s1865_s27  ;;  %v1334_v21 = vadd.f32 %v2980_v50, %v1333_v40 }
 0x1cd   :  { %848 = vrot.lane.b32.xlu0 %v699_v27, %s1864_s26 }
 0x1ce   :  { %v769_v37 = vpop.permute.xlu2 %768 }
 0x1cf   :  { %v1399_v54 = vpop.f32.mrf.mxu2 }
 0x1d0   :  { %v2988_v46 = vadd.f32 %v2980_v50, %v1399_v54  ;;  %v1438_v0 = vpop.f32.mrf.mxu3 }
 0x1d3   :  { %794 = vrot.lane.b32.xlu1 %v2897_v45, %s1864_s26 }
 0x1d4   :  { %944 = vrot.lane.b32.xlu2 %v2534_v12, %s1865_s27 }
 0x1d5   :  { %928 = vrot.lane.b32.xlu0 %v3336_v25, %s1865_s27  ;;  %v961_v13 = vpop.permute.xlu1 %960  ;;  %v813_v42 = vpop.permute.xlu0 %812  ;;  %v1060_v25 = vsel %vm1050_vm0, %v3340_v6, %v769_v37 }
 0x1d6   :  { %v787_v11 = vpop.permute.xlu2 %786  ;;  %v1132_v59 = vsel %vm1101_vm1, %v1081_v17, %v961_v13  ;;  %v1082_v36 = vsel %vm1050_vm0, %v2525_v43, %v813_v42  ;;  %v3338_v43 = vld [vmem:[#allocation15_spill] sm:$0xff]  ;;  %v1439_v13 = vadd.f32 %v2980_v50, %v1438_v0 }
 0x1d7   :  { %1776 = vmatmul.msk.f32.gmra.mxu2 %vm1159_vm2, %v1132_v59 }
 0x1db   :  { %998 = vrot.lane.b32.xlu1 %v1866_v41, %s1865_s27 }
 0x1dc   :  { %778 = vrot.lane.b32.xlu2 %v2838_v55, %s1864_s26 }
 0x1dd   :  { %v935_v62 = vpop.permute.xlu1 %934 }
 0x1de   :  { %v815_v33 = vpop.permute.xlu2 %814  ;;  %v1119_v4 = vsel %vm1101_vm1, %v1068_v44, %v935_v62  ;;  %v963_v63 = vpop.permute.xlu0 %962  ;;  %v1436_v44 = vadd.f32 %v2980_v50, %v1435_v39 }
 0x1df   :  { %1763 = vmatmul.msk.f32.gmra.mxu1 %vm1159_vm2, %v1119_v4  ;;  %v1133_v47 = vsel %vm1101_vm1, %v1082_v36, %v963_v63  ;;  %v1083_v18 = vsel %vm1050_vm0, %v3338_v43, %v815_v33  ;;  %v1441_v62 = vpop.f32.mrf.mxu3 }
 0x1e0   :  { %1777 = vmatmul.msk.f32.gmra.mxu2 %vm1159_vm2, %v1133_v47  ;;  %v1495_v33 = vmax.f32 %v1436_v44, %v1439_v13  ;;  %v1442_v39 = vadd.f32 %v2980_v50, %v1441_v62 }
 0x1e2   :  { %v1520_v36 = vmax.f32 %v1495_v33, 0.0 }
 0x1e3   :  { %796 = vrot.lane.b32.xlu1 %v2534_v12, %s1864_s26  ;;  %v3339_v12 = vld [vmem:[#allocation14_spill] sm:$0xff] }
 0x1e4   :  { %946 = vrot.lane.b32.xlu2 %v2213_v3, %s1865_s27  ;;  %v1069_v27 = vsel %vm1050_vm0, %v3339_v12, %v787_v11 }
 0x1e5   :  { %v989_v55 = vpop.permute.xlu1 %988 }
 0x1e6   :  { %v965_v30 = vpop.permute.xlu2 %964  ;;  %v1146_v31 = vsel %vm1101_vm1, %v1095_v26, %v989_v55 }
 0x1e7   :  { %v937_v3 = vpop.permute.xlu0 %936  ;;  %v1134_v7 = vsel %vm1101_vm1, %v1083_v18, %v965_v30  ;;  %1790 = vmatmul.msk.f32.gmra.mxu3 %vm1159_vm2, %v1146_v31 }
 0x1e8   :  { %v1120_v14 = vsel %vm1101_vm1, %v1069_v27, %v937_v3  ;;  %v1402_v23 = vpop.f32.mrf.mxu2  ;;  %1778 = vmatmul.msk.f32.gmra.mxu2 %vm1159_vm2, %v1134_v7 }
 0x1e9   :  { %1764 = vmatmul.msk.f32.gmra.mxu1 %vm1159_vm2, %v1120_v14  ;;  %v2993_v35 = vadd.f32 %v2980_v50, %v1402_v23 }
 0x1eb   :  { %v1489_v24 = vmax.f32 %v2988_v46, %v2993_v35  ;;  %v1678_v46 = vld [vmem:[%s3301_s5 + $0xc0] sm:$0xff] }
 0x1ec   :  { %1713 = vmatpush.msrb.mxu2 %v1678_v46 }
 0x1ed   :  { %v919_v29 = vpop.permute.xlu1 %918 }
 0x1ee   :  { %v939_v5 = vpop.permute.xlu2 %938  ;;  %v1111_v51 = vsel %vm1101_vm1, %v1060_v25, %v919_v29 }
 0x1ef   :  { %v991_v20 = vpop.permute.xlu0 %990  ;;  %1755 = vmatmul.msk.f32.gmra.mxu0 %vm1159_vm2, %v1111_v51 }
 0x1f1   :  { %v1336_v9 = vpop.f32.mrf.mxu0 }
 0x1f2   :  { %v1337_v22 = vadd.f32 %v2980_v50, %v1336_v9 }
 0x1f4   :  { %v1478_v15 = vmax.f32 %v1334_v21, %v1337_v22 }
 0x1f5   :  { %v841_v17 = vpop.permute.xlu1 %840 }
 0x1f6   :  { %v1503_v42 = vmax.f32 %v1478_v15, 0.0  ;;  %v1096_v37 = vsel %vm1050_vm0, %v2585_v8, %v841_v17  ;;  %v993_v11 = vpop.permute.xlu2 %992 }
 0x1f7   :  { %v921_v59 = vpop.permute.xlu0 %920  ;;  %v1147_v41 = vsel %vm1101_vm1, %v1096_v37, %v991_v20 }
 0x1f8   :  { %1528 = vrot.lane.b32.xlu0 %v1503_v42, %s1864_s26  ;;  %1791 = vmatmul.msk.f32.gmra.mxu3 %vm1159_vm2, %v1147_v41 }
 0x1fd   :  { %v771_v4 = vpop.permute.xlu1 %770 }
 0x1fe   :  { %v1061_v63 = vsel %vm1050_vm0, %v2613_v10, %v771_v4  ;;  %v923_v54 = vpop.permute.xlu2 %922 }
 0x1ff   :  { %v843_v47 = vpop.permute.xlu0 %842  ;;  %v1112_v8 = vsel %vm1101_vm1, %v1061_v63, %v921_v59 }
 0x200   :  { %v1097_v26 = vsel %vm1050_vm0, %v2669_v58, %v843_v47  ;;  %v1444_v55 = vpop.f32.mrf.mxu3  ;;  %1619 = vrot.lane.b32.xlu0 %v1520_v36, %s1865_s27  ;;  %1756 = vmatmul.msk.f32.gmra.mxu0 %vm1159_vm2, %v1112_v8 }
 0x201   :  { %v1445_v43 = vadd.f32 %v2980_v50, %v1444_v55  ;;  %v1148_v18 = vsel %vm1101_vm1, %v1097_v26, %v993_v11 }
 0x202   :  { %1792 = vmatmul.msk.f32.gmra.mxu3 %vm1159_vm2, %v1148_v18 }
 0x203   :  { %v1496_v10 = vmax.f32 %v1442_v39, %v1445_v43 }
 0x205   :  { %v1521_v30 = vmax.f32 %v1496_v10, 0.0  ;;  %v789_v31 = vpop.permute.xlu1 %788 }
 0x206   :  { %v1070_v12 = vsel %vm1050_vm0, %v2646_v48, %v789_v31  ;;  %v845_v58 = vpop.permute.xlu2 %844 }
 0x207   :  { %v773_v27 = vpop.permute.xlu0 %772  ;;  %1623 = vrot.lane.b32.xlu2 %v1521_v30, %s1867_s4  ;;  %v1405_v3 = vpop.f32.mrf.mxu2  ;;  %v1121_v7 = vsel %vm1101_vm1, %v1070_v12, %v939_v5  ;;  %v1098_v59 = vsel %vm1050_vm0, %v2701_v1, %v845_v58 }
 0x208   :  { %v1062_v14 = vsel %vm1050_vm0, %v2693_v56, %v773_v27  ;;  %1765 = vmatmul.msk.f32.gmra.mxu1 %vm1159_vm2, %v1121_v7  ;;  %v3031_v29 = vadd.f32 %v2980_v50, %v1405_v3  ;;  %v1339_v3 = vpop.f32.mrf.mxu0 }
 0x209   :  { %v1113_v23 = vsel %vm1101_vm1, %v1062_v14, %v923_v54 }
 0x20a   :  { %1757 = vmatmul.msk.f32.gmra.mxu0 %vm1159_vm2, %v1113_v23 }
 0x20d   :  { %v817_v40 = vpop.permute.xlu1 %816 }
 0x20e   :  { %v775_v6 = vpop.permute.xlu2 %774  ;;  %v1084_v56 = vsel %vm1050_vm0, %v2653_v49, %v817_v40 }
 0x20f   :  { %v791_v48 = vpop.permute.xlu0 %790  ;;  %v1063_v54 = vsel %vm1050_vm0, %v2724_v19, %v775_v6 }
 0x210   :  { %v1408_v25 = vpop.f32.mrf.mxu2  ;;  %v1071_v22 = vsel %vm1050_vm0, %v2675_v34, %v791_v48 }
 0x211   :  { %v3034_v0 = vadd.f32 %v2980_v50, %v1408_v25 }
 0x212   :  { %v1342_v25 = vpop.f32.mrf.mxu0 }
 0x213   :  { %v1490_v5 = vmax.f32 %v3031_v29, %v3034_v0  ;;  %v1665_v29 = vld [vmem:[%s3301_s5 + $0x58] sm:$0xff]  ;;  %v1664_v0 = vld [vmem:[%s3301_s5 + $0x50] sm:$0xff] }
 0x215   :  { %v967_v51 = vpop.permute.xlu1 %966 }
 0x216   :  { %v793_v20 = vpop.permute.xlu2 %792  ;;  %v1135_v9 = vsel %vm1101_vm1, %v1084_v56, %v967_v51 }
 0x217   :  { %v819_v21 = vpop.permute.xlu0 %818  ;;  %1779 = vmatmul.msk.f32.gmra.mxu2 %vm1159_vm2, %v1135_v9 }
 0x218   :  { %v1085_v42 = vsel %vm1050_vm0, %v2745_v52, %v819_v21  ;;  %v1072_v52 = vsel %vm1050_vm0, %v2776_v53, %v793_v20 }
 0x21d   :  { %v941_v15 = vpop.permute.xlu1 %940 }
 0x21e   :  { %v821_v17 = vpop.permute.xlu2 %820  ;;  %v1122_v13 = vsel %vm1101_vm1, %v1071_v22, %v941_v15 }
 0x21f   :  { %v969_v37 = vpop.permute.xlu0 %968  ;;  %1766 = vmatmul.msk.f32.gmra.mxu1 %vm1159_vm2, %v1122_v13  ;;  %v1411_v11 = vpop.f32.mrf.mxu2  ;;  %v1086_v34 = vsel %vm1050_vm0, %v2836_v2, %v821_v17 }
 0x220   :  { %v1136_v49 = vsel %vm1101_vm1, %v1085_v42, %v969_v37  ;;  %v3063_v2 = vadd.f32 %v2980_v50, %v1411_v11 }
 0x221   :  { %1780 = vmatmul.msk.f32.gmra.mxu2 %vm1159_vm2, %v1136_v49 }
 0x225   :  { %v995_v41 = vpop.permute.xlu1 %994 }
 0x226   :  { %v971_v44 = vpop.permute.xlu2 %970  ;;  %v1149_v62 = vsel %vm1101_vm1, %v1098_v59, %v995_v41 }
 0x227   :  { %v943_v33 = vpop.permute.xlu0 %942  ;;  %v1137_v4 = vsel %vm1101_vm1, %v1086_v34, %v971_v44  ;;  %1793 = vmatmul.msk.f32.gmra.mxu3 %vm1159_vm2, %v1149_v62 }
 0x228   :  { %v1123_v36 = vsel %vm1101_vm1, %v1072_v52, %v943_v33  ;;  %v1414_v1 = vpop.f32.mrf.mxu2  ;;  %v1447_v52 = vpop.f32.mrf.mxu3 }
 0x229   :  { %1767 = vmatmul.msk.f32.gmra.mxu1 %vm1159_vm2, %v1123_v36  ;;  %1781 = vmatmul.msk.f32.gmra.mxu2 %vm1159_vm2, %v1137_v4  ;;  %v3066_v63 = vadd.f32 %v2980_v50, %v1414_v1  ;;  %v1345_v51 = vpop.f32.mrf.mxu0 }
 0x22a   :  { %v1346_v11 = vadd.f32 %v2980_v50, %v1345_v51 }
 0x22b   :  { %v1491_v53 = vmax.f32 %v3063_v2, %v3066_v63  ;;  %v1668_v2 = vld [vmem:[%s3301_s5 + $0x70] sm:$0xff]  ;;  %v1515_v63 = vmax.f32 %v1490_v5, 0.0  ;;  %v1673_v5 = vld [vmem:[%s3301_s5 + $0x98] sm:$0xff] }
 0x22d   :  { %v925_v47 = vpop.permute.xlu1 %924 }
 0x22e   :  { %v1114_v8 = vsel %vm1101_vm1, %v1063_v54, %v925_v47  ;;  %v945_v10 = vpop.permute.xlu2 %944 }
 0x22f   :  { %v997_v26 = vpop.permute.xlu0 %996  ;;  %1758 = vmatmul.msk.f32.gmra.mxu0 %vm1159_vm2, %v1114_v8 }
 0x230   :  { %v1450_v33 = vpop.f32.mrf.mxu3 }
 0x235   :  { %v847_v55 = vpop.permute.xlu1 %846 }
 0x236   :  { %v1099_v39 = vsel %vm1050_vm0, %v2813_v16, %v847_v55  ;;  %v779_v58 = vpop.permute.xlu2 %778 }
 0x237   :  { %v927_v43 = vpop.permute.xlu0 %926  ;;  %v1150_v18 = vsel %vm1101_vm1, %v1099_v39, %v997_v26  ;;  %v1065_v7 = vsel %vm1050_vm0, %v2909_v57, %v779_v58  ;;  %v1343_v26 = vadd.f32 %v2980_v50, %v1342_v25  ;;  %v1340_v39 = vadd.f32 %v2980_v50, %v1339_v3 }
 0x238   :  { %1794 = vmatmul.msk.f32.gmra.mxu3 %vm1159_vm2, %v1150_v18  ;;  %v1453_v36 = vpop.f32.mrf.mxu3 }
 0x239   :  { %v1479_v18 = vmax.f32 %v1340_v39, %v1343_v26 }
 0x23a   :  { %v1348_v13 = vpop.f32.mrf.mxu0 }
 0x23b   :  { %v1349_v37 = vadd.f32 %v2980_v50, %v1348_v13 }
 0x23d   :  { %v777_v30 = vpop.permute.xlu1 %776  ;;  %v1480_v59 = vmax.f32 %v1346_v11, %v1349_v37 }
 0x23e   :  { %v1064_v19 = vsel %vm1050_vm0, %v2840_v32, %v777_v30  ;;  %v3090_v32 = vpop.f32.mrf.mxu1  ;;  %v947_v20 = vpop.permute.xlu2 %946  ;;  %v1451_v30 = vadd.f32 %v2980_v50, %v1450_v33 }
 0x23f   :  { %v849_v31 = vpop.permute.xlu0 %848  ;;  %v1115_v12 = vsel %vm1101_vm1, %v1064_v19, %v927_v43  ;;  %v1505_v62 = vmax.f32 %v1480_v59, 0.0 }
 0x240   :  { %1759 = vmatmul.msk.f32.gmra.mxu0 %vm1159_vm2, %v1115_v12  ;;  %v1100_v6 = vsel %vm1050_vm0, %v2893_v61, %v849_v31  ;;  %v1448_v12 = vadd.f32 %v2980_v50, %v1447_v52 }
 0x241   :  { %v1456_v43 = vpop.f32.mrf.mxu3 }
 0x243   :  { %v1351_v31 = vpop.f32.mrf.mxu0 }
 0x245   :  { %v795_v27 = vpop.permute.xlu1 %794 }
 0x246   :  { %v1073_v16 = vsel %vm1050_vm0, %v2872_v60, %v795_v27  ;;  %v1375_v57 = vpop.f32.mrf.mxu1  ;;  %v1497_v27 = vmax.f32 %v1448_v12, %v1451_v30 }
 0x247   :  { %v929_v14 = vpop.permute.xlu0 %928  ;;  %v1124_v23 = vsel %vm1101_vm1, %v1073_v16, %v945_v10  ;;  %v1376_v61 = vadd.f32 %v2980_v50, %v1375_v57  ;;  %v1504_v10 = vmax.f32 %v1479_v18, 0.0 }
 0x248   :  { %v1116_v40 = vsel %vm1101_vm1, %v1065_v7, %v929_v14  ;;  %1768 = vmatmul.msk.f32.gmra.mxu1 %vm1159_vm2, %v1124_v23  ;;  %v1522_v16 = vmax.f32 %v1497_v27, 0.0 }
 0x249   :  { %1760 = vmatmul.msk.f32.gmra.mxu0 %vm1159_vm2, %v1116_v40 }
 0x24d   :  { %v999_v48 = vpop.permute.xlu1 %998 }
 0x24e   :  { %v1151_v60 = vsel %vm1101_vm1, %v1100_v6, %v999_v48 }
 0x24f   :  { %1795 = vmatmul.msk.f32.gmra.mxu3 %vm1159_vm2, %v1151_v60 }
 0x255   :  { %v797_v56 = vpop.permute.xlu1 %796 }
 0x256   :  { %v1074_v9 = vsel %vm1050_vm0, %v2897_v45, %v797_v56 }
 0x257   :  { %v1125_v21 = vsel %vm1101_vm1, %v1074_v9, %v947_v20 }
 0x258   :  { %1769 = vmatmul.msk.f32.gmra.mxu1 %vm1159_vm2, %v1125_v21  ;;  %v1457_v21 = vadd.f32 %v2980_v50, %v1456_v43 }
 0x25a   :  { %v1417_v22 = vpop.f32.mrf.mxu2 }
 0x25b   :  { %v3106_v41 = vadd.f32 %v2980_v50, %v1417_v22 }
 0x25c   :  { %v1378_v15 = vpop.f32.mrf.mxu1 }
 0x25d   :  { %v1379_v17 = vadd.f32 %v2980_v50, %v1378_v15 }
 0x25f   :  { %v1485_v42 = vmax.f32 %v1376_v61, %v1379_v17  ;;  %v1454_v61 = vadd.f32 %v2980_v50, %v1453_v36 }
 0x261   :  { %v1510_v49 = vmax.f32 %v1485_v42, 0.0 }
 0x263   :  { %1556 = vrot.lane.b32.xlu2 %v1510_v49, %s1868_s10  ;;  %v1420_v45 = vpop.f32.mrf.mxu2  ;;  %v1498_v49 = vmax.f32 %v1454_v61, %v1457_v21  ;;  %v1677_v21 = vld [vmem:[%s3301_s5 + $0xb8] sm:$0xff]  ;;  %v1516_v61 = vmax.f32 %v1491_v53, 0.0  ;;  %v1667_v53 = vld [vmem:[%s3301_s5 + $0x68] sm:$0xff] }
 0x264   :  { %v3109_v34 = vadd.f32 %v2980_v50, %v1420_v45  ;;  %1714 = vmatpush.msrb.mxu2 %v1677_v21 }
 0x266   :  { %v1492_v44 = vmax.f32 %v3106_v41, %v3109_v34  ;;  %v1381_v4 = vpop.f32.mrf.mxu1 }
 0x267   :  { %v1382_v54 = vadd.f32 %v2980_v50, %v1381_v4  ;;  %v1352_v4 = vadd.f32 %v2980_v50, %v1351_v31 }
 0x268   :  { %v1517_v31 = vmax.f32 %v1492_v44, 0.0 }
 0x26a   :  { %v3120_v58 = vpop.f32.mrf.mxu3 }
 0x26b   :  { %1536 = vrot.lane.b32.xlu2 %v1505_v62, %s1867_s4  ;;  %v1423_v19 = vpop.f32.mrf.mxu2  ;;  %v1523_v62 = vmax.f32 %v1498_v49, 0.0  ;;  %v1674_v49 = vld [vmem:[%s3301_s5 + $0xa0] sm:$0xff] }
 0x26c   :  { %v3124_v3 = vadd.f32 %v2980_v50, %v1423_v19  ;;  %v1354_v14 = vpop.f32.mrf.mxu0 }
 0x26d   :  { %v1355_v52 = vadd.f32 %v2980_v50, %v1354_v14 }
 0x27b   :  { %v3129_v40 = vpop.f32.mrf.mxu3 }
 0x27d   :  { %v3134_v25 = vpop.f32.mrf.mxu0 }
 0x285   :  { %v1384_v1 = vpop.f32.mrf.mxu1  ;;  %v1465_v57 = vpop.f32.mrf.mxu3 }
 0x286   :  { %v1385_v47 = vadd.f32 %v2980_v50, %v1384_v1  ;;  %v1466_v33 = vadd.f32 %v2980_v50, %v1465_v57  ;;  %v1463_v57 = vadd.f32 %v2980_v50, %v3129_v40 }
 0x287   :  { %v3140_v17 = vpop.f32.mrf.mxu0 }
 0x288   :  { %v1486_v8 = vmax.f32 %v1382_v54, %v1385_v47  ;;  %v1481_v54 = vmax.f32 %v1352_v4, %v1355_v52  ;;  %v1361_v40 = vadd.f32 %v2980_v50, %v3140_v17  ;;  %v1675_v17 = vld [vmem:[%s3301_s5 + $0xa8] sm:$0xff]  ;;  %v1624_v4 = vpop.permute.xlu2 %1623 }
 0x28a   :  { %v1511_v55 = vmax.f32 %v1486_v8, 0.0  ;;  %v1506_v8 = vmax.f32 %v1481_v54, 0.0  ;;  %v1671_v54 = vld [vmem:[%s3301_s5 + $0x88] sm:$0xff] }
 0x28c   :  { %1560 = vrot.lane.b32.xlu1 %v1511_v55, %s1869_s11 }
 0x294   :  { %1532 = vrot.lane.b32.xlu1 %v1504_v10, %s1865_s27  ;;  %s1871_s27 = smov 80   ;;  %v1514_v10 = vmax.f32 %v1489_v24, 0.0 }
 0x29a   :  { %v1426_v7 = vpop.f32.mrf.mxu2 }
 0x29b   :  { %v3127_v23 = vadd.f32 %v2980_v50, %v1426_v7 }
 0x29c   :  { %1627 = vrot.lane.b32.xlu1 %v1522_v16, %s1870_s12  ;;  %v1387_v6 = vpop.f32.mrf.mxu1 }
 0x29d   :  { %v1493_v48 = vmax.f32 %v3124_v3, %v3127_v23  ;;  %v1388_v51 = vadd.f32 %v2980_v50, %v1387_v6 }
 0x2a4   :  { %v1429_v60 = vpop.f32.mrf.mxu2 }
 0x2a5   :  { %v1430_v13 = vadd.f32 %v2980_v50, %v1429_v60  ;;  %v1373_v60 = vadd.f32 %v2980_v50, %v3090_v32 }
 0x2a6   :  { %v1390_v56 = vpop.f32.mrf.mxu1 }
 0x2a7   :  { %v1391_v20 = vadd.f32 %v2980_v50, %v1390_v56 }
 0x2a9   :  { %v1487_v9 = vmax.f32 %v1388_v51, %v1391_v20  ;;  %v1460_v20 = vadd.f32 %v2980_v50, %v3120_v58 }
 0x2aa   :  { %v1468_v37 = vpop.f32.mrf.mxu3 }
 0x2ab   :  { %v1512_v22 = vmax.f32 %v1487_v9, 0.0  ;;  %v1469_v59 = vadd.f32 %v2980_v50, %v1468_v37  ;;  %v1499_v9 = vmax.f32 %v1460_v20, %v1463_v57  ;;  %v1666_v37 = vld [vmem:[%s3301_s5 + $0x60] sm:$0xff] }
 0x2ac   :  { %v1432_v15 = vpop.f32.mrf.mxu2  ;;  %v1363_v1 = vpop.f32.mrf.mxu0 }
 0x2ad   :  { %v1433_v42 = vadd.f32 %v2980_v50, %v1432_v15  ;;  %1564 = vrot.lane.b32.xlu0 %v1512_v22, %s1871_s27  ;;  %v1500_v36 = vmax.f32 %v1466_v33, %v1469_v59  ;;  %v1364_v55 = vadd.f32 %v2980_v50, %v1363_v1  ;;  %v1524_v32 = vmax.f32 %v1499_v9, 0.0  ;;  %v1661_v59 = vld [vmem:[%s3301_s5 + $0x38] sm:$0xff]  ;;  %v1529_v33 = vpop.permute.xlu0 %1528  ;;  %v1659_v1 = vld [vmem:[%s3301_s5 + $0x28] sm:$0xff] }
 0x2ae   :  { %v1358_v15 = vadd.f32 %v2980_v50, %v3134_v25  ;;  %v1669_v25 = vld [vmem:[%s3301_s5 + $0x78] sm:$0xff] }
 0x2af   :  { %v1494_v11 = vmax.f32 %v1430_v13, %v1433_v42  ;;  %v1525_v47 = vmax.f32 %v1500_v36, 0.0  ;;  %v1676_v42 = vld [vmem:[%s3301_s5 + $0xb0] sm:$0xff]  ;;  %1686 = vmatpush.msrb.mxu1 %v1669_v25 }
 0x2b0   :  { %v1482_v58 = vmax.f32 %v1358_v15, %v1361_v40  ;;  %1715 = vmatpush.msrb.mxu2 %v1676_v42  ;;  %v1660_v36 = vld [vmem:[%s3301_s5 + $0x30] sm:$0xff] }
 0x2b1   :  { %v1519_v45 = vmax.f32 %v1494_v11, 0.0  ;;  %1687 = vmatpush.msrb.mxu1 %v1668_v2  ;;  %v1663_v11 = vld [vmem:[%s3301_s5 + $0x48] sm:$0xff] }
 0x2b2   :  { %v1507_v13 = vmax.f32 %v1482_v58, 0.0  ;;  %1716 = vmatpush.msrb.mxu2 %v1675_v17 }
 0x2b3   :  { %1615 = vrot.lane.b32.xlu1 %v1519_v45, %s1864_s26  ;;  %s1874_s26 = smov 48   ;;  %1688 = vmatpush.msrb.mxu1 %v1667_v53  ;;  %v1662_v45 = vld [vmem:[%s3301_s5 + $0x40] sm:$0xff] }
 0x2b4   :  { %1717 = vmatpush.msrb.mxu2 %v1674_v49 }
 0x2b5   :  { %1631 = vrot.lane.b32.xlu0 %v1523_v62, %s1872_s3  ;;  %1689 = vmatpush.msrb.mxu1 %v1666_v37  ;;  %v1672_v62 = vld [vmem:[%s3301_s5 + $0x90] sm:$0xff] }
 0x2b6   :  { %1718 = vmatpush.msrb.mxu2 %v1673_v5 }
 0x2b7   :  { %1690 = vmatpush.msrb.mxu1 %v1665_v29 }
 0x2b8   :  { %1719 = vmatpush.msrb.mxu2 %v1672_v62 }
 0x2b9   :  { %1691 = vmatpush.msrb.mxu1 %v1664_v0 }
 0x2ba   :  { %1720 = vmatpush.msrb.mxu2 %v1671_v54 }
 0x2bb   :  { %1639 = vrot.lane.b32.xlu1 %v1525_v47, %s1873_s13  ;;  %v1471_v30 = vpop.f32.mrf.mxu3  ;;  %1692 = vmatpush.msrb.mxu1 %v1663_v11  ;;  %v1832_v11 = vld [vmem:[%s3302_s6] ss:$0 sm:$0xff] }
 0x2bc   :  { %v1472_v27 = vadd.f32 %v2980_v50, %v1471_v30 }
 0x2bd   :  { %1540 = vrot.lane.b32.xlu0 %v1506_v8, %s1870_s12  ;;  %v1366_v26 = vpop.f32.mrf.mxu0  ;;  %1693 = vmatpush.msrb.mxu1 %v1662_v45  ;;  %v1620_v8 = vpop.permute.xlu0 %1619 }
 0x2be   :  { %v1367_v39 = vadd.f32 %v2980_v50, %v1366_v26  ;;  %v1557_v26 = vpop.permute.xlu2 %1556 }
 0x2bf   :  { %1694 = vmatpush.msrb.mxu1 %v1661_v59 }
 0x2c0   :  { %v1483_v43 = vmax.f32 %v1364_v55, %v1367_v39  ;;  %v1658_v55 = vld [vmem:[%s3301_s5 + $0x20] sm:$0xff]  ;;  %v1657_v39 = vld [vmem:[%s3301_s5 + $0x18] sm:$0xff] }
 0x2c1   :  { %1695 = vmatpush.msrb.mxu1 %v1660_v36 }
 0x2c2   :  { %v1508_v18 = vmax.f32 %v1483_v43, 0.0  ;;  %v1670_v43 = vld [vmem:[%s3301_s5 + $0x80] sm:$0xff] }
 0x2c3   :  { %1696 = vmatpush.msrb.mxu1 %v1659_v1  ;;  %1721 = vmatpush.msrb.mxu2 %v1670_v43 }
 0x2c4   :  { %1548 = vrot.lane.b32.xlu1 %v1508_v18, %s1874_s26 }
 0x2c5   :  { %v1393_v19 = vpop.f32.mrf.mxu1  ;;  %1697 = vmatpush.msrb.mxu1 %v1658_v55 }
 0x2c6   :  { %v1369_v7 = vpop.f32.mrf.mxu0  ;;  %v1394_v14 = vadd.f32 %v2980_v50, %v1393_v19  ;;  %v1537_v19 = vpop.permute.xlu2 %1536 }
 0x2c7   :  { %v1370_v34 = vadd.f32 %v2980_v50, %v1369_v7  ;;  %1698 = vmatpush.msrb.mxu1 %v1657_v39 }
 0x2c9   :  { %v1484_v51 = vmax.f32 %v1370_v34, %v1373_v60 }
 0x2cb   :  { %v1509_v22 = vmax.f32 %v1484_v51, 0.0 }
 0x2cc   :  { %1572 = vrot.lane.b32.xlu1 %v1514_v10, %s1875_s14  ;;  %v1656_v10 = vld [vmem:[%s3301_s5 + $0x10] sm:$0xff]  ;;  %s1880_s14 = smov [#allocation2]  }
 0x2cd   :  { %1699 = vmatpush.msrb.mxu1 %v1656_v10 }
 0x2d2   :  { %v1474_v12 = vpop.f32.mrf.mxu3 }
 0x2d3   :  { %v1475_v16 = vadd.f32 %v2980_v50, %v1474_v12  ;;  %v1655_v12 = vld [vmem:[%s3301_s5 + $0x8] sm:$0xff] }
 0x2d4   :  { %1584 = vrot.lane.b32.xlu1 %v1517_v31, %s1876_s15  ;;  %1700 = vmatpush.msrb.mxu1 %v1655_v12  ;;  %s1733_s15 = sshll.u32 %s1880_s14, 4  ;;  %s1734_s15 = int_to_ptr.vmem [resolvable:$true] %s1733_s15 }
 0x2d5   :  { %v1501_v35 = vmax.f32 %v1472_v27, %v1475_v16  ;;  %v1396_v24 = vpop.f32.mrf.mxu1  ;;  %v1654_v27 = vld [vmem:[%s3301_s5] sm:$0xff]  ;;  %v1518_v16 = vmax.f32 %v1493_v48, 0.0 }
 0x2d6   :  { %v1397_v41 = vadd.f32 %v2980_v50, %v1396_v24  ;;  %1701 = vmatpush.msrb.mxu1 %v1654_v27 }
 0x2d7   :  { %v1526_v44 = vmax.f32 %v1501_v35, 0.0 }
 0x2d8   :  { %v1488_v6 = vmax.f32 %v1394_v14, %v1397_v41  ;;  %v1331_v14 = vadd.f32 %v2980_v50, %v2961_v28 }
 0x2d9   :  { %1643 = vrot.lane.b32.xlu0 %v1526_v44, %s1868_s10  ;;  %v1328_v44 = vadd.f32 %v2980_v50, %v2952_v38 }
 0x2da   :  { %v1513_v56 = vmax.f32 %v1488_v6, 0.0 }
 0x2db   :  { %v1477_v23 = vmax.f32 %v1328_v44, %v1331_v14 }
 0x2dc   :  { %1568 = vrot.lane.b32.xlu2 %v1513_v56, %s1877_s18  ;;  %s1735_s18 = sshll.u32 %s3303_s7, 4  ;;  %s1736_s18 = int_to_ptr.hbm [resolvable:$true] %s1735_s18 }
 0x2dd   :  { %v1502_v57 = vmax.f32 %v1477_v23, 0.0 }
 0x2df   :  { %v1587_v51 = vsel %vm1050_vm0, %v1502_v57, %v1529_v33 }
 0x2e1   :  { %1552 = vrot.lane.b32.xlu0 %v1509_v22, %s1873_s13 }
 0x2e4   :  { %1635 = vrot.lane.b32.xlu2 %v1524_v32, %s1874_s26 }
 0x2e9   :  { %1580 = vrot.lane.b32.xlu0 %v1516_v61, %s1878_s21 }
 0x2ec   :  { %1544 = vrot.lane.b32.xlu2 %v1507_v13, %s1872_s3 }
 0x2f4   :  { %1576 = vrot.lane.b32.xlu2 %v1515_v63, %s1879_s8 }
 0x2fe   :  { %v3234_v52 = vpop.permute.xlu1 %1560 }
 0x306   :  { %v1533_v47 = vpop.permute.xlu1 %1532 }
 0x307   :  { %v1588_v38 = vsel %vm1101_vm1, %v1587_v51, %v1533_v47 }
 0x308   :  { %v1589_v22 = vsel %vm1159_vm2, %v1588_v38, %v1537_v19 }
 0x30e   :  { %v1628_v18 = vpop.permute.xlu1 %1627 }
 0x31f   :  { %v1565_v30 = vpop.permute.xlu0 %1564 }
 0x325   :  { %v1616_v31 = vpop.permute.xlu1 %1615 }
 0x326   :  { %v1646_v35 = vsel %vm1050_vm0, %v1518_v16, %v1616_v31 }
 0x327   :  { %v1632_v7 = vpop.permute.xlu0 %1631  ;;  %v1647_v24 = vsel %vm1101_vm1, %v1646_v35, %v1620_v8 }
 0x328   :  { %v1648_v34 = vsel %vm1159_vm2, %v1647_v24, %v1624_v4 }
 0x329   :  { %v1649_v48 = vsel %vm1590_vm3, %v1648_v34, %v1628_v18 }
 0x32a   :  { %v1650_v60 = vsel %vm1592_vm4, %v1649_v48, %v1632_v7 }
 0x32d   :  { %v1640_v41 = vpop.permute.xlu1 %1639 }
 0x32f   :  { %v1541_v6 = vpop.permute.xlu0 %1540 }
 0x330   :  { %v1591_v32 = vsel %vm1590_vm3, %v1589_v22, %v1541_v6 }
 0x336   :  { %v1569_v46 = vpop.permute.xlu2 %1568  ;;  %v1549_v56 = vpop.permute.xlu1 %1548 }
 0x33e   :  { %v1636_v3 = vpop.permute.xlu2 %1635  ;;  %v1573_v15 = vpop.permute.xlu1 %1572 }
 0x33f   :  { %v1651_v28 = vsel %vm1594_vm5, %v1650_v60, %v1636_v3 }
 0x340   :  { %v1652_v50 = vsel %vm1596_vm6, %v1651_v28, %v1640_v41 }
 0x346   :  { %v1545_v21 = vpop.permute.xlu2 %1544  ;;  %v1585_v29 = vpop.permute.xlu1 %1584 }
 0x347   :  { %v1593_v40 = vsel %vm1592_vm4, %v1591_v32, %v1545_v21 }
 0x348   :  { %v1595_v58 = vsel %vm1594_vm5, %v1593_v40, %v1549_v56 }
 0x34b   :  { %v1644_v20 = vpop.permute.xlu0 %1643 }
 0x34c   :  { %v1653_v9 = vsel %vm1598_vm7, %v1652_v50, %v1644_v20 }
 0x34d   :  { %1796 = vmatmul.msk.f32.vlgmr.msrb.gmra.mxu2 %vm1600_vm8, %v1653_v9 }
 0x34e   :  { %v1577_v63 = vpop.permute.xlu2 %1576 }
 0x353   :  { %v1553_v61 = vpop.permute.xlu0 %1552 }
 0x354   :  { %v1597_v13 = vsel %vm1596_vm6, %v1595_v58, %v1553_v61 }
 0x355   :  { %v1599_v42 = vsel %vm1598_vm7, %v1597_v13, %v1557_v26 }
 0x356   :  { %v1601_v25 = vsel %vm1600_vm8, %v1599_v42, %v3234_v52 }
 0x357   :  { %v1603_v17 = vsel %vm1602_vm9, %v1601_v25, %v1565_v30 }
 0x358   :  { %v1605_v2 = vsel %vm1604_vm10, %v1603_v17, %v1569_v46 }
 0x359   :  { %v1607_v53 = vsel %vm1606_vm11, %v1605_v2, %v1573_v15 }
 0x35a   :  { %v1609_v37 = vsel %vm1608_vm12, %v1607_v53, %v1577_v63 }
 0x35b   :  { %v1581_v49 = vpop.permute.xlu0 %1580 }
 0x35c   :  { %v1611_v0 = vsel %vm1610_vm13, %v1609_v37, %v1581_v49 }
 0x35d   :  { %v1613_v5 = vsel %vm1612_vm14, %v1611_v0, %v1585_v29 }
 0x35e   :  { %1702 = vmatmul.f32.vlgmr.msrb.gmra.mxu1 %v1613_v5 }
 0x3d0   :  { %v1723_v62 = vpop.f32.mrf.mxu2 }
 0x3db   :  { %v1703_v45 = vpop.f32.mrf.mxu1 }
 0x3dc   :  { %v1704_v59 = vadd.f32 %v1832_v11, %v1703_v45 }
 0x3de   :  { %v1724_v52 = vadd.f32 %v1723_v62, %v1704_v59 }
 0x3e0   :  { %v1726_v33 = vmax.f32 %v1724_v52, 0.0 }
 0x3e2   :  { %1727 = vst.msk [vmem:[#allocation2] sm:$0xff] %vm1101_vm1, %v1726_v33 }
 0x3e3   :  { %1738 = dma.vmem_to_hbm [thread:$0]  %s1734_s15, 128, %s1736_s18, [#allocation3]  }
 0x3e4   :  { %1861 = dma.done.wait [#allocation3], 128  }
 0x3e5   :  { %1862 = vsyncadd [#allocation3], 4294967168 }
 0x3e6   :  { %1743 = vsyncpa [#allocation3], 1 }

</bundles_post_ra>
